<compile_context>
chip_gen: v7x
topology: tpu7x:2x2x1
jax: 0.10.0
libtpu: 0.0.40
codegen_flags: <defaults>
</compile_context>

<pallas_src>
import functools
import math

import jax
import jax.numpy as jnp
from jax.experimental import pallas as pl
from jax.experimental.pallas import tpu as pltpu


def _round_up(x, m):
    return ((x + m - 1) // m) * m


def _choose_tiles(n):
    """Pick (tile_r, tile_c, padded_n) for the attention kernel.

    tile_c (softmax reduction axis) is the largest power-of-two candidate that does
    not pad the node axis by more than ~25%; tile_r is capped at half the padded
    node count so num_r >= 2 and the 'parallel' row axis can shard across the two
    TensorCores on v7x.
    """
    n128 = _round_up(n, 128)
    tile_c = 256
    for cand in (2048, 1024, 512, 256):
        if _round_up(n128, cand) <= max(_round_up(n128, 256), int(n128 * 1.25)):
            tile_c = cand
            break
    tile_r = 128
    for cand in (512, 256, 128):
        if 2 * cand <= max(256, n128):
            tile_r = cand
            break
    n_pad = _round_up(n, max(tile_r, tile_c))
    return tile_r, tile_c, n_pad


def _proj_kernel(h_ref, w_ref, a_ref, wh_ref, f12_ref):
    # Wh = h @ W (bf16 operands, f32 accumulation on the MXU).
    wh = jnp.dot(h_ref[...], w_ref[...], preferred_element_type=jnp.float32)
    a = a_ref[...]                                       # (2, fout) f32
    # Fused attention mat-vecs as VPU lane reductions (no width-1 MXU matmuls).
    f12_ref[:, 0:1] = jnp.sum(wh * a[0:1, :], axis=1, keepdims=True)
    f12_ref[:, 1:2] = jnp.sum(wh * a[1:2, :], axis=1, keepdims=True)
    wh_ref[...] = wh.astype(wh_ref.dtype)                # bf16 "value" matrix for kernel 2


def _attn_kernel(f1_ref, f2t_ref, adj_ref, wh_ref, out_ref,
                 m_ref, l_ref, acc_ref, *, alpha, concat, tile_c, wh_resident):
    j = pl.program_id(1)

    @pl.when(j == 0)
    def _():
        m_ref[...] = jnp.full_like(m_ref, -jnp.inf)
        l_ref[...] = jnp.zeros_like(l_ref)
        acc_ref[...] = jnp.zeros_like(acc_ref)

    if wh_resident:
        # Wh / f2^T live fully in VMEM; slice out this column tile.
        col0 = pl.multiple_of(j * tile_c, tile_c)
        f2t = f2t_ref[:, pl.ds(col0, tile_c)]            # (1, tile_c) f32
        wh = wh_ref[pl.ds(col0, tile_c), :]              # (tile_c, fout) bf16
    else:
        f2t = f2t_ref[...]
        wh = wh_ref[...]

    # e = leakyrelu(f1_i + f2_j); for 0 < alpha < 1, leakyrelu(x) == max(x, alpha*x)
    # (one VPU op fewer than cmp+select).
    e = f1_ref[...] + f2t                                # (TR,1)+(1,TC) -> (TR,TC) f32
    if 0.0 < alpha < 1.0:
        e = jnp.maximum(e, jnp.float32(alpha) * e)
    else:
        e = jnp.where(e > 0.0, e, jnp.float32(alpha) * e)
    # Mask non-edges with the same -9e15 trick as the PyTorch module
    # (single cmp+select directly on the int8 adj tile).
    e = jnp.where(adj_ref[...] > 0, e, jnp.float32(-9e15))

    # Online-softmax update (running max / sum / accumulator in VMEM scratch).
    m_prev = m_ref[...]
    m_new = jnp.maximum(m_prev, jnp.max(e, axis=1, keepdims=True))
    correction = jnp.exp(m_prev - m_new)
    p = jnp.exp(e - m_new)                               # (TR,TC) f32
    l_ref[...] = correction * l_ref[...] + jnp.sum(p, axis=1, keepdims=True)
    acc_ref[...] = correction * acc_ref[...] + jnp.dot(
        p.astype(wh.dtype), wh, preferred_element_type=jnp.float32)
    m_ref[...] = m_new

    # (attention dropout skipped: inference mode)

    @pl.when(j == pl.num_programs(1) - 1)
    def _():
        # EUP approximate reciprocal (~1e-3 rel error vs exact division).
        h_prime = acc_ref[...] * pl.reciprocal(l_ref[...], approx=True)
        if concat:
            # ELU(x) = x if x > 0 else exp(x) - 1
            h_prime = jnp.where(h_prime > 0.0, h_prime, jnp.exp(h_prime) - 1.0)
        out_ref[...] = h_prime.astype(out_ref.dtype)


def gat_forward(h, adj, W, a, *, alpha=0.2, concat=True):
    """Pallas GAT layer forward (inference).

    h:   (N, in_features)            float32
    adj: (N, N)                      any dtype, >0 marks an edge
    W:   (in_features, out_features) float32
    a:   (2*out_features, 1)         float32

    A row of adj with no edges degenerates to a (near-)uniform softmax, exactly like
    the PyTorch -9e15 trick (over the padded node count if N was padded).
    """
    N, fin = h.shape
    fout = W.shape[1]

    tile_r, tile_c, Np = _choose_tiles(N)
    num_r = Np // tile_r
    num_c = Np // tile_c

    # bf16 operands for the MXU matmuls (f32 accumulation inside the kernels);
    # also halves the HBM bytes of the h / W / Wh streams.
    h_bf = h.astype(jnp.bfloat16)
    w_bf = W.astype(jnp.bfloat16)
    a_rows = a.reshape(2, fout).astype(jnp.float32)      # row 0 = a1, row 1 = a2

    # adj only acts as a mask: ship it as int8 (4x fewer HBM/VMEM bytes than f32).
    adj_mask = (adj > 0).astype(jnp.int8)

    # Pad the node axis up to a tile multiple: padded rows of h are zero and padded
    # columns of adj are zero (non-edges), so they never contribute; padded output
    # rows are sliced off at the end.  Avoids the full-(N,N)-block VMEM fallback.
    if Np != N:
        pad = Np - N
        h_bf = jnp.pad(h_bf, ((0, pad), (0, 0)))
        adj_mask = jnp.pad(adj_mask, ((0, pad), (0, pad)))

    # Kernel 1 row tile: large (or single grid step) — the projection is tiny.
    if Np <= 2048:
        tile_r1 = Np
    else:
        tile_r1 = next(c for c in (2048, 1024, 512, 256, 128) if Np % c == 0)
    num_r1 = Np // tile_r1

    # VMEM budgets: 48 MiB is safe on v7x (64 MiB physical) and roomy on v5e/v6e.
    cparams1 = pltpu.CompilerParams(
        dimension_semantics=("parallel",),
        vmem_limit_bytes=32 * 1024 * 1024)
    cparams2 = pltpu.CompilerParams(
        dimension_semantics=("parallel", "arbitrary"),
        vmem_limit_bytes=48 * 1024 * 1024)

    # ---- Kernel 1: projection + fused attention mat-vecs -------------------
    wh, f12 = pl.pallas_call(
        _proj_kernel,
        out_shape=(
            jax.ShapeDtypeStruct((Np, fout), jnp.bfloat16),
            jax.ShapeDtypeStruct((Np, 2), jnp.float32),
        ),
        grid=(num_r1,),
        in_specs=[
            pl.BlockSpec((tile_r1, fin), lambda i: (i, 0)),
            pl.BlockSpec((fin, fout), lambda i: (0, 0)),
            pl.BlockSpec((2, fout), lambda i: (0, 0)),
        ],
        out_specs=(
            pl.BlockSpec((tile_r1, fout), lambda i: (i, 0)),
            pl.BlockSpec((tile_r1, 2), lambda i: (i, 0)),
        ),
        compiler_params=cparams1,
    )(h_bf, w_bf, a_rows)

    f1 = f12[:, 0:1]                     # (Np, 1) row-side logits
    f2t = f12[:, 1].reshape(1, Np)       # (1, Np) column-side logits (lane-major)

    # ---- Kernel 2: row-tiled masked softmax(att) @ Wh (online softmax) -----
    # Keep Wh (and f2^T) fully VMEM-resident when they fit: removes the per-row-tile
    # re-streaming of Wh from HBM (was ~equal to the whole int8 adj stream).
    resident_bytes = 2 * (Np * fout * 2 + Np * 4)        # double-buffered Wh + f2t
    adj_tile_bytes = 2 * tile_r * tile_c                 # double-buffered int8 adj tile
    wh_resident = (resident_bytes + adj_tile_bytes) <= 24 * 1024 * 1024

    if wh_resident:
        f2t_spec = pl.BlockSpec((1, Np), lambda i, j: (0, 0))
        wh_spec = pl.BlockSpec((Np, fout), lambda i, j: (0, 0))
    else:
        f2t_spec = pl.BlockSpec((1, tile_c), lambda i, j: (0, j))
        wh_spec = pl.BlockSpec((tile_c, fout), lambda i, j: (j, 0))

    kernel2 = functools.partial(
        _attn_kernel, alpha=float(alpha), concat=concat,
        tile_c=tile_c, wh_resident=wh_resident)

    out = pl.pallas_call(
        kernel2,
        out_shape=jax.ShapeDtypeStruct((Np, fout), jnp.float32),
        grid=(num_r, num_c),
        in_specs=[
            pl.BlockSpec((tile_r, 1), lambda i, j: (i, 0)),        # f1 (row side)
            f2t_spec,                                              # f2^T (col side)
            pl.BlockSpec((tile_r, tile_c), lambda i, j: (i, j)),   # adj mask (int8)
            wh_spec,                                               # Wh (bf16, values)
        ],
        out_specs=pl.BlockSpec((tile_r, fout), lambda i, j: (i, 0)),
        scratch_shapes=[
            pltpu.VMEM((tile_r, 1), jnp.float32),     # running row max
            pltpu.VMEM((tile_r, 1), jnp.float32),     # running row sum
            pltpu.VMEM((tile_r, fout), jnp.float32),  # output accumulator
        ],
        compiler_params=cparams2,
    )(f1, f2t, adj_mask, wh)

    return out[:N] if Np != N else out


def _xavier_uniform(key, shape, gain):
    fan_in, fan_out = shape[0], shape[1]
    bound = gain * math.sqrt(6.0 / (fan_in + fan_out))
    return jax.random.uniform(key, shape, jnp.float32, -bound, bound)


if __name__ == "__main__":
    alpha = 0.2

    def run_case(case_key, N, in_features, out_features):
        k_h, k_adj, k_w, k_a = jax.random.split(case_key, 4)

        # deterministic parameter init (xavier_uniform, gain=1.414 as in the module)
        W = _xavier_uniform(k_w, (in_features, out_features), gain=1.414)
        a = _xavier_uniform(k_a, (2 * out_features, 1), gain=1.414)

        h = jax.random.normal(k_h, (N, in_features), jnp.float32)
        adj = (jax.random.uniform(k_adj, (N, N)) > 0.9).astype(jnp.float32)
        # self-loops so every row has at least one edge (typical GAT usage)
        adj = jnp.maximum(adj, jnp.eye(N, dtype=jnp.float32))

        out = gat_forward(h, adj, W, a, alpha=alpha, concat=True)
        jax.block_until_ready(out)

        # Reference with the SAME precision policy (bf16 MXU operands, f32 accumulation,
        # f32 logits) so the comparison checks kernel logic, not the bf16 choice.
        Wh = jnp.dot(h.astype(jnp.bfloat16), W.astype(jnp.bfloat16),
                     preferred_element_type=jnp.float32)
        e = (Wh @ a[:out_features]) + (Wh @ a[out_features:]).T
        e = jnp.where(e > 0, e, alpha * e)
        att = jax.nn.softmax(jnp.where(adj > 0, e, -9e15), axis=1)
        ref = jnp.dot(att.astype(jnp.bfloat16), Wh.astype(jnp.bfloat16),
                      preferred_element_type=jnp.float32)
        ref = jnp.where(ref > 0, ref, jnp.exp(ref) - 1.0)

        assert out.shape == (N, out_features)
        err = jnp.abs(out - ref)
        assert float(jnp.mean(err)) < 5e-3, "mean error too large vs JAX reference"
        assert jnp.allclose(out, ref, atol=5e-2, rtol=5e-2), "mismatch vs JAX reference"

    key = jax.random.PRNGKey(0)
    k1, k2 = jax.random.split(key)
    run_case(k1, 512, 64, 64)   # tile-divisible path (no padding), num_r=2 for v7x
    run_case(k2, 300, 64, 64)   # non-divisible N -> exercises the padded/masked edge path

    print("KERNEL_OK")
</pallas_src>

<mosaic_0001>
module attributes {stable_mosaic.version = 11 : i64} {
  func.func @_proj_kernel(%arg0: i32, %arg1: memref<512x64xbf16, #tpu.memory_space<vmem>>, %arg2: memref<64x64xbf16, #tpu.memory_space<vmem>>, %arg3: memref<2x64xf32, #tpu.memory_space<vmem>>, %arg4: memref<512x64xbf16, #tpu.memory_space<vmem>>, %arg5: memref<512x2xf32, #tpu.memory_space<vmem>>) attributes {dimension_semantics = [#tpu.dimension_semantics<parallel>], iteration_bounds = array<i64: 1>, scalar_prefetch = 0 : i64, scratch_operands = 0 : i64, tpu.core_type = #tpu.core_type<tc>, window_params = [{transform_indices = @transform_0, window_bounds = array<i64: 512, 64>}, {pipeline_mode = #tpu.pipeline_mode<synchronous>, transform_indices = @transform_1, window_bounds = array<i64: 64, 64>}, {pipeline_mode = #tpu.pipeline_mode<synchronous>, transform_indices = @transform_2, window_bounds = array<i64: 2, 64>}, {transform_indices = @transform_3, window_bounds = array<i64: 512, 64>}, {transform_indices = @transform_4, window_bounds = array<i64: 512, 2>}]} {
    %c0 = arith.constant 0 : index
    %c0_0 = arith.constant 0 : index
    %0 = vector.load %arg1[%c0, %c0_0] : memref<512x64xbf16, #tpu.memory_space<vmem>>, vector<512x64xbf16>
    %c0_1 = arith.constant 0 : index
    %c0_2 = arith.constant 0 : index
    %1 = vector.load %arg2[%c0_1, %c0_2] : memref<64x64xbf16, #tpu.memory_space<vmem>>, vector<64x64xbf16>
    %cst = arith.constant dense<0.000000e+00> : vector<512x64xf32>
    %2 = tpu.matmul %0, %1, %cst {dimension_numbers = #tpu.dot_dimension_numbers<[1], [0], [0], [1], [0, 0, 1, 1], [], []>} : vector<512x64xbf16>, vector<64x64xbf16>, vector<512x64xf32> -> vector<512x64xf32>
    %c0_3 = arith.constant 0 : index
    %c0_4 = arith.constant 0 : index
    %3 = vector.load %arg3[%c0_3, %c0_4] : memref<2x64xf32, #tpu.memory_space<vmem>>, vector<2x64xf32>
    %4 = vector.extract_strided_slice %3 {offsets = [0, 0], sizes = [1, 64], strides = [1, 1]} : vector<2x64xf32> to vector<1x64xf32>
    %5 = vector.broadcast %4 : vector<1x64xf32> to vector<512x64xf32>
    %6 = arith.mulf %2, %5 : vector<512x64xf32>
    %cst_5 = arith.constant dense<0.000000e+00> : vector<512xf32>
    %7 = vector.multi_reduction <add>, %6, %cst_5 [1] : vector<512x64xf32> to vector<512xf32>
    %8 = vector.shape_cast %7 : vector<512xf32> to vector<512x1xf32>
    %c0_6 = arith.constant 0 : index
    %c0_7 = arith.constant 0 : index
    %9 = vector.load %arg5[%c0_6, %c0_7] : memref<512x2xf32, #tpu.memory_space<vmem>>, vector<512x1xf32>
    tpu.vector_store %arg5[%c0_6, %c0_7], %8 {strides = array<i32>} : memref<512x2xf32, #tpu.memory_space<vmem>>, vector<512x1xf32>,
    %10 = vector.extract_strided_slice %3 {offsets = [1, 0], sizes = [1, 64], strides = [1, 1]} : vector<2x64xf32> to vector<1x64xf32>
    %11 = vector.broadcast %10 : vector<1x64xf32> to vector<512x64xf32>
    %12 = arith.mulf %2, %11 : vector<512x64xf32>
    %cst_8 = arith.constant dense<0.000000e+00> : vector<512xf32>
    %13 = vector.multi_reduction <add>, %12, %cst_8 [1] : vector<512x64xf32> to vector<512xf32>
    %14 = vector.shape_cast %13 : vector<512xf32> to vector<512x1xf32>
    %c0_9 = arith.constant 0 : index
    %c1 = arith.constant 1 : index
    %15 = vector.load %arg5[%c0_9, %c1] : memref<512x2xf32, #tpu.memory_space<vmem>>, vector<512x1xf32>
    tpu.vector_store %arg5[%c0_9, %c1], %14 {strides = array<i32>} : memref<512x2xf32, #tpu.memory_space<vmem>>, vector<512x1xf32>,
    %16 = arith.truncf %2 : vector<512x64xf32> to vector<512x64xbf16>
    %c0_10 = arith.constant 0 : index
    %c0_11 = arith.constant 0 : index
    %17 = vector.load %arg4[%c0_10, %c0_11] : memref<512x64xbf16, #tpu.memory_space<vmem>>, vector<512x64xbf16>
    tpu.vector_store %arg4[%c0_10, %c0_11], %16 {strides = array<i32>} : memref<512x64xbf16, #tpu.memory_space<vmem>>, vector<512x64xbf16>,
    return
  }
  func.func @transform_0(%arg0: i32) -> (i32, i32) {
    %c0_i32 = arith.constant 0 : i32
    %c0_i32_0 = arith.constant 0 : i32
    return %arg0, %c0_i32 : i32, i32
  }
  func.func @transform_1(%arg0: i32) -> (i32, i32) {
    %c0_i32 = arith.constant 0 : i32
    %c0_i32_0 = arith.constant 0 : i32
    %c0_i32_1 = arith.constant 0 : i32
    return %c0_i32, %c0_i32_0 : i32, i32
  }
  func.func @transform_2(%arg0: i32) -> (i32, i32) {
    %c0_i32 = arith.constant 0 : i32
    %c0_i32_0 = arith.constant 0 : i32
    %c0_i32_1 = arith.constant 0 : i32
    return %c0_i32, %c0_i32_0 : i32, i32
  }
  func.func @transform_3(%arg0: i32) -> (i32, i32) {
    %c0_i32 = arith.constant 0 : i32
    %c0_i32_0 = arith.constant 0 : i32
    return %arg0, %c0_i32 : i32, i32
  }
  func.func @transform_4(%arg0: i32) -> (i32, i32) {
    %c0_i32 = arith.constant 0 : i32
    %c0_i32_0 = arith.constant 0 : i32
    return %arg0, %c0_i32 : i32, i32
  }
}

</mosaic_0001>

<bundles_post_ra>
// kernel: tpu_custom_call.1
= control target key start
LH: loop header
LB: loop body
LE: loop exit
PB: predicated region body
PF: predicated region fallthrough
CT: control target
= control target key end

     0   :  { %vm273_vm0 = vcmask 523264   ;;  %v660_v36 = vlaneseq  ;;  %vm1566_vm1 = vcmask 519168   ;;  %vm920_vm2 = vcmask 7168   ;;  %s3543_s1 = inlined_call_operand.vmem [shape: bf16[64,64], index: 1, kind: input, shape index: {}]   ;;  %s3544_s0 = inlined_call_operand.vmem [shape: bf16[512,64], index: 0, kind: input, shape index: {}]   ;;  %s3545_s2 = inlined_call_operand.vmem [shape: f32[2,64], index: 2, kind: input, shape index: {}]   ;;  %s3546_s3 = inlined_call_operand.vmem [shape: bf16[512,64], index: 3, kind: output, shape index: {0}]   ;;  %s3547_s4 = inlined_call_operand.vmem [shape: f32[512,2], index: 4, kind: output, shape index: {1}]  }
   0x1   :  { %v1951_v0 = vld [vmem:[%s3543_s1] sm:$0xff]   ;;  %v1952_v1 = vld [vmem:[%s3543_s1 + $0x8] sm:$0xff]   ;;  %v1953_v2 = vld [vmem:[%s3543_s1 + $0x10] sm:$0xff]   ;;  %vm1245_vm3 = vcmask 15368  }
   0x2   :  { %1871 = vmatprep.subr.bf16.mxu0 %v1951_v0  ;;  %1943 = vmatprep.subr.bf16.mxu1 %v1951_v0  ;;  %v1955_v3 = vld [vmem:[%s3544_s0] sm:$0xff]   ;;  %v1954_v5 = vld [vmem:[%s3543_s1 + $0x18] sm:$0xff]   ;;  %v1957_v6 = vld [vmem:[%s3544_s0 + $0x8] sm:$0xff]   ;;  %v661_v37 = vshrl.u32 %v660_v36, 7 }
   0x3   :  { %1872 = vmatpush3.bf16.msra.mxu0 %v1951_v0  ;;  %1947 = vmatpush3.bf16.msra.mxu1 %v1951_v0  ;;  %v1956_v4 = vld [vmem:[%s3544_s0 + $0x80] sm:$0xff]   ;;  %v1958_v7 = vld [vmem:[%s3544_s0 + $0x88] sm:$0xff]   ;;  %v1959_v8 = vld [vmem:[%s3544_s0 + $0x10] sm:$0xff]  }
   0x4   :  { %1873 = vmatprep.subr.bf16.mxu0 %v1952_v1  ;;  %1944 = vmatprep.subr.bf16.mxu1 %v1952_v1  ;;  %v1961_v9 = vld [vmem:[%s3544_s0 + $0x90] sm:$0xff]   ;;  %v1960_v10 = vld [vmem:[%s3544_s0 + $0x18] sm:$0xff]   ;;  %v1963_v12 = vld [vmem:[%s3544_s0 + $0x20] sm:$0xff]   ;;  %v662_v38 = vsub.s32 0, %v661_v37  ;;  %v987_v40 = vsub.s32 1, %v661_v37 }
   0x5   :  { %1879 = vmatprep.mubr.msk.bf16.mxu0 %vm273_vm0, %v1955_v3  ;;  %1911 = vmatprep.mubr.msk.bf16.mxu1 %vm273_vm0, %v1956_v4  ;;  %v1962_v11 = vld [vmem:[%s3544_s0 + $0x98] sm:$0xff]   ;;  %v1965_v13 = vld [vmem:[%s3544_s0 + $0xa0] sm:$0xff]   ;;  %v1964_v14 = vld [vmem:[%s3544_s0 + $0x28] sm:$0xff]  }
   0x6   :  { %v1966_v15 = vld [vmem:[%s3544_s0 + $0xa8] sm:$0xff]   ;;  %v1967_v16 = vld [vmem:[%s3544_s0 + $0x30] sm:$0xff]   ;;  %v1968_v18 = vld [vmem:[%s3544_s0 + $0x38] sm:$0xff]  }
   0x7   :  { %1874 = vmatpush3.bf16.msra.mxu0 %v1952_v1  ;;  %1948 = vmatpush3.bf16.msra.mxu1 %v1952_v1  ;;  %v1969_v17 = vld [vmem:[%s3544_s0 + $0xb0] sm:$0xff]   ;;  %v1970_v19 = vld [vmem:[%s3544_s0 + $0xb8] sm:$0xff]   ;;  %v1971_v20 = vld [vmem:[%s3544_s0 + $0x40] sm:$0xff]  }
   0x8   :  { %1875 = vmatprep.subr.bf16.mxu0 %v1953_v2  ;;  %1945 = vmatprep.subr.bf16.mxu1 %v1953_v2  ;;  %v1973_v21 = vld [vmem:[%s3544_s0 + $0xc0] sm:$0xff]   ;;  %v1972_v22 = vld [vmem:[%s3544_s0 + $0x48] sm:$0xff]   ;;  %v1975_v24 = vld [vmem:[%s3544_s0 + $0x50] sm:$0xff]  }
   0x9   :  { %v1974_v23 = vld [vmem:[%s3544_s0 + $0xc8] sm:$0xff]   ;;  %v1977_v25 = vld [vmem:[%s3544_s0 + $0xd0] sm:$0xff]   ;;  %v1976_v26 = vld [vmem:[%s3544_s0 + $0x58] sm:$0xff]  }
   0xa   :  { %v1978_v27 = vld [vmem:[%s3544_s0 + $0xd8] sm:$0xff]   ;;  %v1979_v28 = vld [vmem:[%s3544_s0 + $0x60] sm:$0xff]   ;;  %v1980_v30 = vld [vmem:[%s3544_s0 + $0x68] sm:$0xff]  }
   0xb   :  { %1876 = vmatpush3.bf16.msra.mxu0 %v1953_v2  ;;  %1949 = vmatpush3.bf16.msra.mxu1 %v1953_v2  ;;  %v1981_v29 = vld [vmem:[%s3544_s0 + $0xe0] sm:$0xff]   ;;  %v1982_v31 = vld [vmem:[%s3544_s0 + $0xe8] sm:$0xff]   ;;  %v1983_v32 = vld [vmem:[%s3544_s0 + $0x70] sm:$0xff]  }
   0xc   :  { %1877 = vmatprep.subr.bf16.mxu0 %v1954_v5  ;;  %1946 = vmatprep.subr.bf16.mxu1 %v1954_v5  ;;  %v1984_v33 = vld [vmem:[%s3544_s0 + $0x78] sm:$0xff]   ;;  %v1985_v34 = vld [vmem:[%s3544_s0 + $0xf0] sm:$0xff]   ;;  %v659_v39 = vld [vmem:[%s3545_s2] sm:$0x3] }
   0xd   :  { %v1986_v35 = vld [vmem:[%s3544_s0 + $0xf8] sm:$0xff]   ;;  %v2155_v41 = vrot.slane %v659_v39, %v662_v38  ;;  %v2157_v42 = vrot.slane %v659_v39, %v987_v40 }
   0xf   :  { %1878 = vmatpush3.bf16.msra.mxu0 %v1954_v5  ;;  %1950 = vmatpush3.bf16.msra.mxu1 %v1954_v5 }
  0x12   :  { %1880 = vmatmul.mubr.msk.bf16.vlgmr.msra.gmra.mrb[0].mxu0 %vm273_vm0, %v1957_v6  ;;  %1912 = vmatmul.mubr.msk.bf16.vlgmr.msra.gmra.mrb[0].mxu1 %vm273_vm0, %v1958_v7 }
  0x13   :  { %1883 = vmatprep.mubr.msk.bf16.mxu0 %vm273_vm0, %v1959_v8  ;;  %1915 = vmatprep.mubr.msk.bf16.mxu1 %vm273_vm0, %v1961_v9 }
  0x1a   :  { %1884 = vmatmul.mubr.msk.bf16.gmra.mrb[4].mxu0 %vm273_vm0, %v1960_v10  ;;  %1916 = vmatmul.mubr.msk.bf16.gmra.mrb[4].mxu1 %vm273_vm0, %v1962_v11 }
  0x1b   :  { %1887 = vmatprep.mubr.msk.bf16.mxu0 %vm273_vm0, %v1963_v12  ;;  %1919 = vmatprep.mubr.msk.bf16.mxu1 %vm273_vm0, %v1965_v13 }
  0x22   :  { %1888 = vmatmul.mubr.msk.bf16.gmra.mrb[8].mxu0 %vm273_vm0, %v1964_v14  ;;  %1920 = vmatmul.mubr.msk.bf16.gmra.mrb[8].mxu1 %vm273_vm0, %v1966_v15 }
  0x23   :  { %1891 = vmatprep.mubr.msk.bf16.mxu0 %vm273_vm0, %v1967_v16  ;;  %1923 = vmatprep.mubr.msk.bf16.mxu1 %vm273_vm0, %v1969_v17 }
  0x2a   :  { %1892 = vmatmul.mubr.msk.bf16.gmra.mrb[12].mxu0 %vm273_vm0, %v1968_v18  ;;  %1924 = vmatmul.mubr.msk.bf16.gmra.mrb[12].mxu1 %vm273_vm0, %v1970_v19 }
  0x2b   :  { %1895 = vmatprep.mubr.msk.bf16.mxu0 %vm273_vm0, %v1971_v20  ;;  %1927 = vmatprep.mubr.msk.bf16.mxu1 %vm273_vm0, %v1973_v21 }
  0x32   :  { %1896 = vmatmul.mubr.msk.bf16.gmra.mrb[16].mxu0 %vm273_vm0, %v1972_v22  ;;  %1928 = vmatmul.mubr.msk.bf16.gmra.mrb[16].mxu1 %vm273_vm0, %v1974_v23 }
  0x33   :  { %1899 = vmatprep.mubr.msk.bf16.mxu0 %vm273_vm0, %v1975_v24  ;;  %1931 = vmatprep.mubr.msk.bf16.mxu1 %vm273_vm0, %v1977_v25 }
  0x3a   :  { %1900 = vmatmul.mubr.msk.bf16.gmra.mrb[20].mxu0 %vm273_vm0, %v1976_v26  ;;  %1932 = vmatmul.mubr.msk.bf16.gmra.mrb[20].mxu1 %vm273_vm0, %v1978_v27 }
  0x3b   :  { %1903 = vmatprep.mubr.msk.bf16.mxu0 %vm273_vm0, %v1979_v28  ;;  %1935 = vmatprep.mubr.msk.bf16.mxu1 %vm273_vm0, %v1981_v29 }
  0x42   :  { %1904 = vmatmul.mubr.msk.bf16.gmra.mrb[24].mxu0 %vm273_vm0, %v1980_v30  ;;  %1936 = vmatmul.mubr.msk.bf16.gmra.mrb[24].mxu1 %vm273_vm0, %v1982_v31 }
  0x43   :  { %1907 = vmatprep.mubr.msk.bf16.mxu0 %vm273_vm0, %v1983_v32  ;;  %1939 = vmatprep.mubr.msk.bf16.mxu1 %vm273_vm0, %v1985_v34 }
  0x4a   :  { %1908 = vmatmul.mubr.msk.bf16.gmra.mrb[28].mxu0 %vm273_vm0, %v1984_v33  ;;  %1940 = vmatmul.mubr.msk.bf16.gmra.mrb[28].mxu1 %vm273_vm0, %v1986_v35 }
  0xe5   :  { %v1881_v43 = vpop.f32.mrb[0].mxu0  ;;  %v1913_v44 = vpop.f32.mrb[0].mxu1 }
  0xe6   :  { %v1773_v45 = vpack.c.bf16 %v1881_v43, %v1881_v43  ;;  %v1805_v46 = vpack.c.bf16 %v1913_v44, %v1913_v44  ;;  %v2159_v47 = vpop.f32.mrb[1].mxu0  ;;  %v2161_v48 = vpop.f32.mrb[1].mxu1  ;;  %v698_v49 = vmul.f32 %v1913_v44, %v2155_v41  ;;  %v666_v50 = vmul.f32 %v1881_v43, %v2155_v41 }
  0xe7   :  { %v1771_v51 = vpack.c.bf16 %v2159_v47, %v2159_v47  ;;  %v1803_v52 = vpack.c.bf16 %v2161_v48, %v2161_v48  ;;  %v1882_v53 = vpop.f32.mrb[2].mxu0  ;;  %v1914_v54 = vpop.f32.mrb[2].mxu1  ;;  %v991_v55 = vmul.f32 %v1881_v43, %v2157_v42  ;;  %v1023_v1 = vmul.f32 %v1913_v44, %v2157_v42 }
  0xe8   :  { %1569 = vst.msk [vmem:[%s3546_s3 + $0x8] sm:$0xf] %vm1566_vm1, %v1773_v45  ;;  %1601 = vst.msk [vmem:[%s3546_s3 + $0x88] sm:$0xf] %vm1566_vm1, %v1805_v46  ;;  %v1774_v56 = vpack.c.bf16 %v1882_v53, %v1882_v53  ;;  %v1806_v57 = vpack.c.bf16 %v1914_v54, %v1914_v54  ;;  %v2178_v58 = vpop.f32.mrb[3].mxu0  ;;  %v2180_v59 = vpop.f32.mrb[3].mxu1  ;;  %v667_v0 = vmul.f32 %v1882_v53, %v2155_v41 }
  0xe9   :  { %v830_v60 = vsel %vm273_vm0, %v698_v49, 0.0  ;;  %v734_v61 = vsel %vm273_vm0, %v666_v50, 0.0  ;;  %1567 = vst.msk [vmem:[%s3546_s3] sm:$0xf] %vm1566_vm1, %v1771_v51  ;;  %1599 = vst.msk [vmem:[%s3546_s3 + $0x80] sm:$0xf] %vm1566_vm1, %v1803_v52  ;;  %v1772_v62 = vpack.c.bf16 %v2178_v58, %v2178_v58  ;;  %v1804_v63 = vpack.c.bf16 %v2180_v59, %v2180_v59 }
  0xea   :  { %831 = vadd.xlane.f32.xlu0 %v830_v60  ;;  %735 = vadd.xlane.f32.xlu1 %v734_v61  ;;  %1570 = vst.msk [vmem:[%s3546_s3 + $0xc] sm:$0xf] %vm1566_vm1, %v1774_v56  ;;  %1602 = vst.msk [vmem:[%s3546_s3 + $0x8c] sm:$0xf] %vm1566_vm1, %v1806_v57  ;;  %v1059_v2 = vsel %vm273_vm0, %v991_v55, 0.0  ;;  %v737_v3 = vsel %vm273_vm0, %v667_v0, 0.0  ;;  %v699_v4 = vmul.f32 %v1914_v54, %v2155_v41 }
  0xeb   :  { %1568 = vst.msk [vmem:[%s3546_s3 + $0x4] sm:$0xf] %vm1566_vm1, %v1772_v62  ;;  %1600 = vst.msk [vmem:[%s3546_s3 + $0x84] sm:$0xf] %vm1566_vm1, %v1804_v63  ;;  %v1155_v11 = vsel %vm273_vm0, %v1023_v1, 0.0  ;;  %v664_v12 = vmul.f32 %v2155_v41, %v2159_v47  ;;  %v992_v18 = vmul.f32 %v1882_v53, %v2157_v42  ;;  %v696_v27 = vmul.f32 %v2155_v41, %v2161_v48 }
  0xec   :  { %v833_v17 = vsel %vm273_vm0, %v699_v4, 0.0  ;;  %v1024_v28 = vmul.f32 %v1914_v54, %v2157_v42  ;;  %v989_v33 = vmul.f32 %v2157_v42, %v2159_v47  ;;  %v697_v39 = vmul.f32 %v2155_v41, %v2180_v59 }
  0xed   :  { %v2217_v5 = vpop.f32.mrb[4].mxu0  ;;  %v2219_v6 = vpop.f32.mrb[4].mxu1  ;;  %v728_v25 = vsel %vm273_vm0, %v664_v12, 0.0  ;;  %v1062_v26 = vsel %vm273_vm0, %v992_v18, 0.0  ;;  %v824_v37 = vsel %vm273_vm0, %v696_v27, 0.0  ;;  %v1021_v54 = vmul.f32 %v2157_v42, %v2161_v48 }
  0xee   :  { %1060 = vadd.xlane.f32.xlu0 %v1059_v2  ;;  %738 = vadd.xlane.f32.xlu1 %v737_v3  ;;  %v1777_v7 = vpack.c.bf16 %v2217_v5, %v2217_v5  ;;  %v2223_v8 = vpop.f32.mrb[5].mxu0  ;;  %v1809_v9 = vpack.c.bf16 %v2219_v6, %v2219_v6  ;;  %v2227_v10 = vpop.f32.mrb[5].mxu1  ;;  %v1158_v38 = vsel %vm273_vm0, %v1024_v28, 0.0  ;;  %v1053_v52 = vsel %vm273_vm0, %v989_v33, 0.0 }
  0xef   :  { %v1775_v13 = vpack.c.bf16 %v2223_v8, %v2223_v8  ;;  %v2234_v14 = vpop.f32.mrb[6].mxu0  ;;  %v1807_v15 = vpack.c.bf16 %v2227_v10, %v2227_v10  ;;  %v2238_v16 = vpop.f32.mrb[6].mxu1  ;;  %v827_v53 = vsel %vm273_vm0, %v697_v39, 0.0  ;;  %v990_v55 = vmul.f32 %v2157_v42, %v2178_v58 }
  0xf0   :  { %1573 = vst.msk [vmem:[%s3546_s3 + $0x18] sm:$0xf] %vm1566_vm1, %v1777_v7  ;;  %v1778_v19 = vpack.c.bf16 %v2234_v14, %v2234_v14  ;;  %v2248_v20 = vpop.f32.mrb[7].mxu0  ;;  %1605 = vst.msk [vmem:[%s3546_s3 + $0x98] sm:$0xf] %vm1566_vm1, %v1809_v9  ;;  %v1810_v21 = vpack.c.bf16 %v2238_v16, %v2238_v16  ;;  %v2256_v22 = vpop.f32.mrb[7].mxu1  ;;  %v1022_v61 = vmul.f32 %v2157_v42, %v2180_v59 }
  0xf1   :  { %1571 = vst.msk [vmem:[%s3546_s3 + $0x10] sm:$0xf] %vm1566_vm1, %v1775_v13  ;;  %v1776_v23 = vpack.c.bf16 %v2248_v20, %v2248_v20  ;;  %1603 = vst.msk [vmem:[%s3546_s3 + $0x90] sm:$0xf] %vm1566_vm1, %v1807_v15  ;;  %v1808_v24 = vpack.c.bf16 %v2256_v22, %v2256_v22  ;;  %v1149_v0 = vsel %vm273_vm0, %v1021_v54, 0.0  ;;  %v1056_v1 = vsel %vm273_vm0, %v990_v55, 0.0 }
  0xf2   :  { %1156 = vadd.xlane.f32.xlu0 %v1155_v11  ;;  %834 = vadd.xlane.f32.xlu1 %v833_v17  ;;  %1574 = vst.msk [vmem:[%s3546_s3 + $0x1c] sm:$0xf] %vm1566_vm1, %v1778_v19  ;;  %1606 = vst.msk [vmem:[%s3546_s3 + $0x9c] sm:$0xf] %vm1566_vm1, %v1810_v21  ;;  %v665_v2 = vmul.f32 %v2155_v41, %v2178_v58  ;;  %v1152_v9 = vsel %vm273_vm0, %v1022_v61, 0.0  ;;  %v670_v15 = vmul.f32 %v2217_v5, %v2155_v41 }
  0xf3   :  { %1572 = vst.msk [vmem:[%s3546_s3 + $0x14] sm:$0xf] %vm1566_vm1, %v1776_v23  ;;  %1604 = vst.msk [vmem:[%s3546_s3 + $0x94] sm:$0xf] %vm1566_vm1, %v1808_v24  ;;  %v671_v17 = vmul.f32 %v2234_v14, %v2155_v41 }
  0xf4   :  { %v731_v13 = vsel %vm273_vm0, %v665_v2, 0.0  ;;  %v746_v33 = vsel %vm273_vm0, %v670_v15, 0.0 }
  0xf5   :  { %v2291_v29 = vpop.f32.mrb[8].mxu0  ;;  %v2293_v30 = vpop.f32.mrb[8].mxu1 }
  0xf6   :  { %729 = vadd.xlane.f32.xlu0 %v728_v25  ;;  %1063 = vadd.xlane.f32.xlu1 %v1062_v26  ;;  %v2295_v31 = vpop.f32.mrb[9].mxu0  ;;  %v2297_v32 = vpop.f32.mrb[9].mxu1  ;;  %v1781_v34 = vpack.c.bf16 %v2291_v29, %v2291_v29  ;;  %v1813_v47 = vpack.c.bf16 %v2293_v30, %v2293_v30 }
  0xf7   :  { %v2303_v35 = vpop.f32.mrb[10].mxu0  ;;  %v2305_v36 = vpop.f32.mrb[10].mxu1  ;;  %v1779_v40 = vpack.c.bf16 %v2295_v31, %v2295_v31  ;;  %v1811_v49 = vpack.c.bf16 %v2297_v32, %v2297_v32 }
  0xf8   :  { %v2313_v43 = vpop.f32.mrb[11].mxu0  ;;  %v2315_v44 = vpop.f32.mrb[11].mxu1  ;;  %1577 = vst.msk [vmem:[%s3546_s3 + $0x28] sm:$0xf] %vm1566_vm1, %v1781_v34  ;;  %v1782_v45 = vpack.c.bf16 %v2303_v35, %v2303_v35  ;;  %v1814_v50 = vpack.c.bf16 %v2305_v36, %v2305_v36  ;;  %1609 = vst.msk [vmem:[%s3546_s3 + $0xa8] sm:$0xf] %vm1566_vm1, %v1813_v47 }
  0xf9   :  { %v1780_v46 = vpack.c.bf16 %v2313_v43, %v2313_v43  ;;  %1575 = vst.msk [vmem:[%s3546_s3 + $0x20] sm:$0xf] %vm1566_vm1, %v1779_v40  ;;  %v1812_v51 = vpack.c.bf16 %v2315_v44, %v2315_v44  ;;  %1607 = vst.msk [vmem:[%s3546_s3 + $0xa0] sm:$0xf] %vm1566_vm1, %v1811_v49  ;;  %v749_v34 = vsel %vm273_vm0, %v671_v17, 0.0  ;;  %v668_v17 = vmul.f32 %v2155_v41, %v2223_v8 }
  0xfa   :  { %825 = vadd.xlane.f32.xlu0 %v824_v37  ;;  %1159 = vadd.xlane.f32.xlu1 %v1158_v38  ;;  %1578 = vst.msk [vmem:[%s3546_s3 + $0x2c] sm:$0xf] %vm1566_vm1, %v1782_v45  ;;  %1610 = vst.msk [vmem:[%s3546_s3 + $0xac] sm:$0xf] %vm1566_vm1, %v1814_v50  ;;  %v702_v37 = vmul.f32 %v2219_v6, %v2155_v41  ;;  %v703_v38 = vmul.f32 %v2238_v16, %v2155_v41 }
  0xfb   :  { %1576 = vst.msk [vmem:[%s3546_s3 + $0x24] sm:$0xf] %vm1566_vm1, %v1780_v46  ;;  %1608 = vst.msk [vmem:[%s3546_s3 + $0xa4] sm:$0xf] %vm1566_vm1, %v1812_v51  ;;  %v995_v45 = vmul.f32 %v2217_v5, %v2157_v42  ;;  %v996_v50 = vmul.f32 %v2234_v14, %v2157_v42 }
  0xfc   :  { %v842_v47 = vsel %vm273_vm0, %v702_v37, 0.0  ;;  %v845_v49 = vsel %vm273_vm0, %v703_v38, 0.0 }
  0xfd   :  { %v2367_v48 = vpop.f32.mrb[12].mxu0  ;;  %v2369_v56 = vpop.f32.mrb[12].mxu1 }
  0xfe   :  { %1054 = vadd.xlane.f32.xlu0 %v1053_v52  ;;  %828 = vadd.xlane.f32.xlu1 %v827_v53  ;;  %v2371_v57 = vpop.f32.mrb[13].mxu0  ;;  %v2373_v60 = vpop.f32.mrb[13].mxu1  ;;  %v1785_v59 = vpack.c.bf16 %v2367_v48, %v2367_v48  ;;  %v1817_v12 = vpack.c.bf16 %v2369_v56, %v2369_v56 }
  0xff   :  { %v2377_v62 = vpop.f32.mrb[14].mxu0  ;;  %v2379_v63 = vpop.f32.mrb[14].mxu1  ;;  %v1783_v7 = vpack.c.bf16 %v2371_v57, %v2371_v57  ;;  %v1815_v18 = vpack.c.bf16 %v2373_v60, %v2373_v60 }
 0x100   :  { %v2385_v3 = vpop.f32.mrb[15].mxu0  ;;  %v2387_v4 = vpop.f32.mrb[15].mxu1  ;;  %1581 = vst.msk [vmem:[%s3546_s3 + $0x38] sm:$0xf] %vm1566_vm1, %v1785_v59  ;;  %v1786_v58 = vpack.c.bf16 %v2377_v62, %v2377_v62  ;;  %1613 = vst.msk [vmem:[%s3546_s3 + $0xb8] sm:$0xf] %vm1566_vm1, %v1817_v12  ;;  %v1818_v19 = vpack.c.bf16 %v2379_v63, %v2379_v63  ;;  %v1028_v12 = vmul.f32 %v2238_v16, %v2157_v42 }
 0x101   :  { %v1784_v11 = vpack.c.bf16 %v2385_v3, %v2385_v3  ;;  %1579 = vst.msk [vmem:[%s3546_s3 + $0x30] sm:$0xf] %vm1566_vm1, %v1783_v7  ;;  %v1816_v21 = vpack.c.bf16 %v2387_v4, %v2387_v4  ;;  %1611 = vst.msk [vmem:[%s3546_s3 + $0xb0] sm:$0xf] %vm1566_vm1, %v1815_v18  ;;  %v669_v18 = vmul.f32 %v2155_v41, %v2248_v20 }
 0x102   :  { %1150 = vadd.xlane.f32.xlu0 %v1149_v0  ;;  %1057 = vadd.xlane.f32.xlu1 %v1056_v1  ;;  %1582 = vst.msk [vmem:[%s3546_s3 + $0x3c] sm:$0xf] %vm1566_vm1, %v1786_v58  ;;  %1614 = vst.msk [vmem:[%s3546_s3 + $0xbc] sm:$0xf] %vm1566_vm1, %v1818_v19  ;;  %v1074_v58 = vsel %vm273_vm0, %v996_v50, 0.0  ;;  %v1170_v16 = vsel %vm273_vm0, %v1028_v12, 0.0 }
 0x103   :  { %1580 = vst.msk [vmem:[%s3546_s3 + $0x34] sm:$0xf] %vm1566_vm1, %v1784_v11  ;;  %1612 = vst.msk [vmem:[%s3546_s3 + $0xb4] sm:$0xf] %vm1566_vm1, %v1816_v21  ;;  %v1027_v11 = vmul.f32 %v2219_v6, %v2157_v42  ;;  %v700_v21 = vmul.f32 %v2155_v41, %v2227_v10 }
 0x105   :  { %v2431_v23 = vpop.f32.mrb[16].mxu0  ;;  %v2433_v24 = vpop.f32.mrb[16].mxu1  ;;  %v1167_v6 = vsel %vm273_vm0, %v1027_v11, 0.0 }
 0x106   :  { %1153 = vadd.xlane.f32.xlu1 %v1152_v9  ;;  %732 = vadd.xlane.f32.xlu0 %v731_v13  ;;  %v2439_v25 = vpop.f32.mrb[17].mxu0  ;;  %v2441_v26 = vpop.f32.mrb[17].mxu1  ;;  %v1789_v46 = vpack.c.bf16 %v2431_v23, %v2431_v23  ;;  %v1821_v14 = vpack.c.bf16 %v2433_v24, %v2433_v24  ;;  %v1071_v9 = vsel %vm273_vm0, %v995_v45, 0.0  ;;  %v740_v45 = vsel %vm273_vm0, %v668_v17, 0.0 }
 0x107   :  { %v2451_v27 = vpop.f32.mrb[18].mxu0  ;;  %v2453_v28 = vpop.f32.mrb[18].mxu1  ;;  %v1787_v51 = vpack.c.bf16 %v2439_v25, %v2439_v25  ;;  %v1819_v55 = vpack.c.bf16 %v2441_v26, %v2441_v26 }
 0x108   :  { %v2461_v39 = vpop.f32.mrb[19].mxu0  ;;  %v2463_v40 = vpop.f32.mrb[19].mxu1  ;;  %1585 = vst.msk [vmem:[%s3546_s3 + $0x48] sm:$0xf] %vm1566_vm1, %v1789_v46  ;;  %v1790_v5 = vpack.c.bf16 %v2451_v27, %v2451_v27  ;;  %v1822_v1 = vpack.c.bf16 %v2453_v28, %v2453_v28  ;;  %1617 = vst.msk [vmem:[%s3546_s3 + $0xc8] sm:$0xf] %vm1566_vm1, %v1821_v14  ;;  %v993_v14 = vmul.f32 %v2157_v42, %v2223_v8 }
 0x109   :  { %v1788_v52 = vpack.c.bf16 %v2461_v39, %v2461_v39  ;;  %1583 = vst.msk [vmem:[%s3546_s3 + $0x40] sm:$0xf] %vm1566_vm1, %v1787_v51  ;;  %v1820_v2 = vpack.c.bf16 %v2463_v40, %v2463_v40  ;;  %1615 = vst.msk [vmem:[%s3546_s3 + $0xc0] sm:$0xf] %vm1566_vm1, %v1819_v55  ;;  %v743_v46 = vsel %vm273_vm0, %v669_v18, 0.0  ;;  %v994_v55 = vmul.f32 %v2157_v42, %v2248_v20 }
 0x10a   :  { %747 = vadd.xlane.f32.xlu0 %v746_v33  ;;  %750 = vadd.xlane.f32.xlu1 %v749_v34  ;;  %1586 = vst.msk [vmem:[%s3546_s3 + $0x4c] sm:$0xf] %vm1566_vm1, %v1790_v5  ;;  %1618 = vst.msk [vmem:[%s3546_s3 + $0xcc] sm:$0xf] %vm1566_vm1, %v1822_v1  ;;  %v701_v33 = vmul.f32 %v2155_v41, %v2256_v22  ;;  %v836_v5 = vsel %vm273_vm0, %v700_v21, 0.0  ;;  %v1026_v8 = vmul.f32 %v2157_v42, %v2256_v22 }
 0x10b   :  { %1584 = vst.msk [vmem:[%s3546_s3 + $0x44] sm:$0xf] %vm1566_vm1, %v1788_v52  ;;  %1616 = vst.msk [vmem:[%s3546_s3 + $0xc4] sm:$0xf] %vm1566_vm1, %v1820_v2  ;;  %v1065_v2 = vsel %vm273_vm0, %v993_v14, 0.0  ;;  %v675_v18 = vmul.f32 %v2303_v35, %v2155_v41 }
 0x10c   :  { %v839_v52 = vsel %vm273_vm0, %v701_v33, 0.0  ;;  %v1164_v17 = vsel %vm273_vm0, %v1026_v8, 0.0 }
 0x10d   :  { %v2483_v53 = vpop.f32.mrb[20].mxu0  ;;  %v2485_v54 = vpop.f32.mrb[20].mxu1 }
 0x10e   :  { %843 = vadd.xlane.f32.xlu0 %v842_v47  ;;  %846 = vadd.xlane.f32.xlu1 %v845_v49  ;;  %v2495_v61 = vpop.f32.mrb[21].mxu0  ;;  %v2497_v0 = vpop.f32.mrb[21].mxu1  ;;  %v1793_v19 = vpack.c.bf16 %v2483_v53, %v2483_v53  ;;  %v1825_v47 = vpack.c.bf16 %v2485_v54, %v2485_v54 }
 0x10f   :  { %v2511_v59 = vpop.f32.mrb[22].mxu0  ;;  %v2513_v7 = vpop.f32.mrb[22].mxu1  ;;  %v1791_v34 = vpack.c.bf16 %v2495_v61, %v2495_v61  ;;  %v1823_v49 = vpack.c.bf16 %v2497_v0, %v2497_v0 }
 0x110   :  { %v2529_v13 = vpop.f32.mrb[23].mxu0  ;;  %v2531_v15 = vpop.f32.mrb[23].mxu1  ;;  %1589 = vst.msk [vmem:[%s3546_s3 + $0x58] sm:$0xf] %vm1566_vm1, %v1793_v19  ;;  %v1794_v37 = vpack.c.bf16 %v2511_v59, %v2511_v59  ;;  %v1826_v50 = vpack.c.bf16 %v2513_v7, %v2513_v7  ;;  %1621 = vst.msk [vmem:[%s3546_s3 + $0xd8] sm:$0xf] %vm1566_vm1, %v1825_v47 }
 0x111   :  { %v1792_v38 = vpack.c.bf16 %v2529_v13, %v2529_v13  ;;  %1587 = vst.msk [vmem:[%s3546_s3 + $0x50] sm:$0xf] %vm1566_vm1, %v1791_v34  ;;  %1619 = vst.msk [vmem:[%s3546_s3 + $0xd0] sm:$0xf] %vm1566_vm1, %v1823_v49  ;;  %v1824_v51 = vpack.c.bf16 %v2531_v15, %v2531_v15 }
 0x112   :  { %1072 = vadd.xlane.f32.xlu0 %v1071_v9  ;;  %1075 = vadd.xlane.f32.xlu1 %v1074_v58  ;;  %1590 = vst.msk [vmem:[%s3546_s3 + $0x5c] sm:$0xf] %vm1566_vm1, %v1794_v37  ;;  %1622 = vst.msk [vmem:[%s3546_s3 + $0xdc] sm:$0xf] %vm1566_vm1, %v1826_v50  ;;  %v1068_v9 = vsel %vm273_vm0, %v994_v55, 0.0  ;;  %v1025_v58 = vmul.f32 %v2157_v42, %v2227_v10 }
 0x113   :  { %1588 = vst.msk [vmem:[%s3546_s3 + $0x54] sm:$0xf] %vm1566_vm1, %v1792_v38  ;;  %1620 = vst.msk [vmem:[%s3546_s3 + $0xd4] sm:$0xf] %vm1566_vm1, %v1824_v51  ;;  %v761_v51 = vsel %vm273_vm0, %v675_v18, 0.0  ;;  %v705_v18 = vmul.f32 %v2155_v41, %v2315_v44 }
 0x115   :  { %v2607_v1 = vpop.f32.mrb[24].mxu0  ;;  %v2629_v22 = vpop.f32.mrb[24].mxu1 }
 0x116   :  { %1168 = vadd.xlane.f32.xlu0 %v1167_v6  ;;  %1171 = vadd.xlane.f32.xlu1 %v1170_v16  ;;  %v1797_v20 = vpack.c.bf16 %v2607_v1, %v2607_v1  ;;  %v2617_v11 = vpop.f32.mrb[25].mxu0  ;;  %v674_v6 = vmul.f32 %v2291_v29, %v2155_v41  ;;  %v1161_v16 = vsel %vm273_vm0, %v1025_v58, 0.0  ;;  %v2643_v33 = vpop.f32.mrb[25].mxu1  ;;  %v1829_v38 = vpack.c.bf16 %v2629_v22, %v2629_v22 }
 0x117   :  { %v1795_v12 = vpack.c.bf16 %v2617_v11, %v2617_v11  ;;  %v2627_v10 = vpop.f32.mrb[26].mxu0  ;;  %v2647_v37 = vpop.f32.mrb[26].mxu1 }
 0x118   :  { %1593 = vst.msk [vmem:[%s3546_s3 + $0x68] sm:$0xf] %vm1566_vm1, %v1797_v20  ;;  %v1798_v19 = vpack.c.bf16 %v2627_v10, %v2627_v10  ;;  %v2641_v21 = vpop.f32.mrb[27].mxu0  ;;  %v1830_v47 = vpack.c.bf16 %v2647_v37, %v2647_v37  ;;  %v2665_v49 = vpop.f32.mrb[27].mxu1  ;;  %v758_v50 = vsel %vm273_vm0, %v674_v6, 0.0  ;;  %v1031_v20 = vmul.f32 %v2293_v30, %v2157_v42 }
 0x119   :  { %1591 = vst.msk [vmem:[%s3546_s3 + $0x60] sm:$0xf] %vm1566_vm1, %v1795_v12  ;;  %v1796_v34 = vpack.c.bf16 %v2641_v21, %v2641_v21  ;;  %1625 = vst.msk [vmem:[%s3546_s3 + $0xe8] sm:$0xf] %vm1566_vm1, %v1829_v38  ;;  %v1032_v12 = vmul.f32 %v2305_v36, %v2157_v42  ;;  %v997_v38 = vmul.f32 %v2157_v42, %v2295_v31 }
 0x11a   :  { %741 = vadd.xlane.f32.xlu0 %v740_v45  ;;  %744 = vadd.xlane.f32.xlu1 %v743_v46  ;;  %1594 = vst.msk [vmem:[%s3546_s3 + $0x6c] sm:$0xf] %vm1566_vm1, %v1798_v19  ;;  %v1827_v45 = vpack.c.bf16 %v2643_v33, %v2643_v33  ;;  %v706_v46 = vmul.f32 %v2293_v30, %v2155_v41  ;;  %1626 = vst.msk [vmem:[%s3546_s3 + $0xec] sm:$0xf] %vm1566_vm1, %v1830_v47  ;;  %v1179_v6 = vsel %vm273_vm0, %v1031_v20, 0.0 }
 0x11b   :  { %1592 = vst.msk [vmem:[%s3546_s3 + $0x64] sm:$0xf] %vm1566_vm1, %v1796_v34  ;;  %v851_v34 = vsel %vm273_vm0, %v705_v18, 0.0 }
 0x11c   :  { %1623 = vst.msk [vmem:[%s3546_s3 + $0xe0] sm:$0xf] %vm1566_vm1, %v1827_v45  ;;  %v854_v14 = vsel %vm273_vm0, %v706_v46, 0.0  ;;  %v998_v45 = vmul.f32 %v2157_v42, %v2313_v43  ;;  %v1077_v46 = vsel %vm273_vm0, %v997_v38, 0.0 }
 0x11e   :  { %837 = vadd.xlane.f32.xlu0 %v836_v5  ;;  %840 = vadd.xlane.f32.xlu1 %v839_v52  ;;  %v707_v5 = vmul.f32 %v2305_v36, %v2155_v41  ;;  %v1828_v52 = vpack.c.bf16 %v2665_v49, %v2665_v49  ;;  %v704_v36 = vmul.f32 %v2155_v41, %v2297_v32  ;;  %v1080_v47 = vsel %vm273_vm0, %v998_v45, 0.0 }
 0x120   :  { %1624 = vst.msk [vmem:[%s3546_s3 + $0xe4] sm:$0xf] %vm1566_vm1, %v1828_v52  ;;  %v857_v55 = vsel %vm273_vm0, %v707_v5, 0.0  ;;  %v848_v19 = vsel %vm273_vm0, %v704_v36, 0.0  ;;  %v2725_v5 = vpop.f32.mrb[28].mxu0 }
 0x122   :  { %1066 = vadd.xlane.f32.xlu0 %v1065_v2  ;;  %1069 = vadd.xlane.f32.xlu1 %v1068_v9  ;;  %v999_v2 = vmul.f32 %v2291_v29, %v2157_v42  ;;  %v1000_v9 = vmul.f32 %v2303_v35, %v2157_v42  ;;  %v1182_v29 = vsel %vm273_vm0, %v1032_v12, 0.0  ;;  %v672_v35 = vmul.f32 %v2155_v41, %v2295_v31 }
 0x123   :  { %v1801_v31 = vpack.c.bf16 %v2725_v5, %v2725_v5 }
 0x124   :  { %v1083_v58 = vsel %vm273_vm0, %v999_v2, 0.0  ;;  %v1086_v8 = vsel %vm273_vm0, %v1000_v9, 0.0  ;;  %v679_v9 = vmul.f32 %v2377_v62, %v2155_v41 }
 0x125   :  { %1597 = vst.msk [vmem:[%s3546_s3 + $0x78] sm:$0xf] %vm1566_vm1, %v1801_v31  ;;  %v1035_v31 = vmul.f32 %v2369_v56, %v2157_v42 }
 0x126   :  { %1162 = vadd.xlane.f32.xlu0 %v1161_v16  ;;  %1165 = vadd.xlane.f32.xlu1 %v1164_v17  ;;  %v673_v16 = vmul.f32 %v2155_v41, %v2313_v43  ;;  %v752_v17 = vsel %vm273_vm0, %v672_v35, 0.0  ;;  %v2729_v43 = vpop.f32.mrb[29].mxu0  ;;  %v710_v35 = vmul.f32 %v2369_v56, %v2155_v41  ;;  %v773_v18 = vsel %vm273_vm0, %v679_v9, 0.0 }
 0x127   :  { %v1799_v52 = vpack.c.bf16 %v2729_v43, %v2729_v43  ;;  %v709_v9 = vmul.f32 %v2155_v41, %v2387_v4 }
 0x128   :  { %v755_v30 = vsel %vm273_vm0, %v673_v16, 0.0  ;;  %v866_v38 = vsel %vm273_vm0, %v710_v35, 0.0  ;;  %v1002_v35 = vmul.f32 %v2157_v42, %v2385_v3 }
 0x129   :  { %1595 = vst.msk [vmem:[%s3546_s3 + $0x70] sm:$0xf] %vm1566_vm1, %v1799_v52  ;;  %v1036_v52 = vmul.f32 %v2379_v63, %v2157_v42 }
 0x12a   :  { %759 = vadd.xlane.f32.xlu0 %v758_v50  ;;  %762 = vadd.xlane.f32.xlu1 %v761_v51  ;;  %v1029_v50 = vmul.f32 %v2157_v42, %v2297_v32  ;;  %v1030_v51 = vmul.f32 %v2157_v42, %v2315_v44  ;;  %v2739_v32 = vpop.f32.mrb[30].mxu0  ;;  %v2741_v44 = vpop.f32.mrb[28].mxu1 }
 0x12b   :  { %v2755_v20 = vpop.f32.mrb[29].mxu1 }
 0x12c   :  { %v1176_v2 = vsel %vm273_vm0, %v1030_v51, 0.0  ;;  %v1831_v16 = vpack.c.bf16 %v2755_v20, %v2755_v20 }
 0x12e   :  { %855 = vadd.xlane.f32.xlu0 %v854_v14  ;;  %858 = vadd.xlane.f32.xlu1 %v857_v55  ;;  %v678_v14 = vmul.f32 %v2367_v48, %v2155_v41  ;;  %v1173_v55 = vsel %vm273_vm0, %v1029_v50, 0.0  ;;  %1627 = vst.msk [vmem:[%s3546_s3 + $0xf0] sm:$0xf] %vm1566_vm1, %v1831_v16 }
 0x130   :  { %v770_v36 = vsel %vm273_vm0, %v678_v14, 0.0  ;;  %v1191_v14 = vsel %vm273_vm0, %v1035_v31, 0.0 }
 0x132   :  { %1084 = vadd.xlane.f32.xlu0 %v1083_v58  ;;  %1087 = vadd.xlane.f32.xlu1 %v1086_v8  ;;  %v1802_v58 = vpack.c.bf16 %v2739_v32, %v2739_v32  ;;  %v2753_v8 = vpop.f32.mrb[31].mxu0 }
 0x133   :  { %v1800_v12 = vpack.c.bf16 %v2753_v8, %v2753_v8 }
 0x134   :  { %1598 = vst.msk [vmem:[%s3546_s3 + $0x7c] sm:$0xf] %vm1566_vm1, %v1802_v58 }
 0x135   :  { %1596 = vst.msk [vmem:[%s3546_s3 + $0x74] sm:$0xf] %vm1566_vm1, %v1800_v12  ;;  %v863_v12 = vsel %vm273_vm0, %v709_v9, 0.0  ;;  %v713_v9 = vmul.f32 %v2155_v41, %v2463_v40 }
 0x136   :  { %1180 = vadd.xlane.f32.xlu0 %v1179_v6  ;;  %1183 = vadd.xlane.f32.xlu1 %v1182_v29  ;;  %v2759_v6 = vpop.f32.mrb[30].mxu1  ;;  %v1833_v29 = vpack.c.bf16 %v2741_v44, %v2741_v44 }
 0x138   :  { %1629 = vst.msk [vmem:[%s3546_s3 + $0xf8] sm:$0xf] %vm1566_vm1, %v1833_v29  ;;  %v1001_v29 = vmul.f32 %v2157_v42, %v2371_v57 }
 0x13a   :  { %753 = vadd.xlane.f32.xlu0 %v752_v17  ;;  %756 = vadd.xlane.f32.xlu1 %v755_v30  ;;  %v1834_v17 = vpack.c.bf16 %v2759_v6, %v2759_v6  ;;  %v2777_v30 = vpop.f32.mrb[31].mxu1  ;;  %v1089_v16 = vsel %vm273_vm0, %v1001_v29, 0.0 }
 0x13c   :  { %1630 = vst.msk [vmem:[%s3546_s3 + $0xfc] sm:$0xf] %vm1566_vm1, %v1834_v17  ;;  %v1092_v17 = vsel %vm273_vm0, %v1002_v35, 0.0  ;;  %v875_v35 = vsel %vm273_vm0, %v713_v9, 0.0  ;;  %v685_v9 = vmul.f32 %v2155_v41, %v2529_v13 }
 0x13e   :  { %849 = vadd.xlane.f32.xlu0 %v848_v19  ;;  %852 = vadd.xlane.f32.xlu1 %v851_v34  ;;  %v711_v19 = vmul.f32 %v2379_v63, %v2155_v41  ;;  %v1832_v34 = vpack.c.bf16 %v2777_v30, %v2777_v30  ;;  %v708_v63 = vmul.f32 %v2155_v41, %v2373_v60 }
 0x140   :  { %1628 = vst.msk [vmem:[%s3546_s3 + $0xf4] sm:$0xf] %vm1566_vm1, %v1832_v34  ;;  %v869_v45 = vsel %vm273_vm0, %v711_v19, 0.0  ;;  %v860_v58 = vsel %vm273_vm0, %v708_v63, 0.0  ;;  %v683_v34 = vmul.f32 %v2451_v27, %v2155_v41  ;;  %v712_v63 = vmul.f32 %v2155_v41, %v2441_v26 }
 0x142   :  { %1078 = vadd.xlane.f32.xlu0 %v1077_v46  ;;  %1081 = vadd.xlane.f32.xlu1 %v1080_v47  ;;  %v1003_v46 = vmul.f32 %v2367_v48, %v2157_v42  ;;  %v1004_v47 = vmul.f32 %v2377_v62, %v2157_v42  ;;  %v1194_v48 = vsel %vm273_vm0, %v1036_v52, 0.0  ;;  %v676_v62 = vmul.f32 %v2155_v41, %v2371_v57 }
 0x143   :  { %v872_v29 = vsel %vm273_vm0, %v712_v63, 0.0  ;;  %v684_v63 = vmul.f32 %v2155_v41, %v2495_v61 }
 0x144   :  { %v1095_v50 = vsel %vm273_vm0, %v1003_v46, 0.0  ;;  %v1098_v51 = vsel %vm273_vm0, %v1004_v47, 0.0 }
 0x146   :  { %1174 = vadd.xlane.f32.xlu0 %v1173_v55  ;;  %1177 = vadd.xlane.f32.xlu1 %v1176_v2  ;;  %v677_v55 = vmul.f32 %v2155_v41, %v2385_v3  ;;  %v764_v2 = vsel %vm273_vm0, %v676_v62, 0.0  ;;  %v682_v3 = vmul.f32 %v2431_v23, %v2155_v41 }
 0x148   :  { %v767_v56 = vsel %vm273_vm0, %v677_v55, 0.0  ;;  %v681_v55 = vmul.f32 %v2155_v41, %v2461_v39 }
 0x14a   :  { %771 = vadd.xlane.f32.xlu0 %v770_v36  ;;  %774 = vadd.xlane.f32.xlu1 %v773_v18  ;;  %v1033_v36 = vmul.f32 %v2157_v42, %v2373_v60  ;;  %v1034_v18 = vmul.f32 %v2157_v42, %v2387_v4  ;;  %v785_v60 = vsel %vm273_vm0, %v683_v34, 0.0  ;;  %v714_v4 = vmul.f32 %v2433_v24, %v2155_v41 }
 0x14c   :  { %v1185_v19 = vsel %vm273_vm0, %v1033_v36, 0.0  ;;  %v1188_v57 = vsel %vm273_vm0, %v1034_v18, 0.0  ;;  %v878_v46 = vsel %vm273_vm0, %v714_v4, 0.0 }
 0x14e   :  { %867 = vadd.xlane.f32.xlu0 %v866_v38  ;;  %870 = vadd.xlane.f32.xlu1 %v869_v45  ;;  %v782_v38 = vsel %vm273_vm0, %v682_v3, 0.0  ;;  %v715_v45 = vmul.f32 %v2453_v28, %v2155_v41 }
 0x150   :  { %v881_v47 = vsel %vm273_vm0, %v715_v45, 0.0 }
 0x152   :  { %1096 = vadd.xlane.f32.xlu0 %v1095_v50  ;;  %1099 = vadd.xlane.f32.xlu1 %v1098_v51  ;;  %v1007_v50 = vmul.f32 %v2431_v23, %v2157_v42  ;;  %v1008_v51 = vmul.f32 %v2451_v27, %v2157_v42  ;;  %v680_v27 = vmul.f32 %v2155_v41, %v2439_v25 }
 0x154   :  { %v1107_v31 = vsel %vm273_vm0, %v1007_v50, 0.0  ;;  %v1110_v52 = vsel %vm273_vm0, %v1008_v51, 0.0  ;;  %v718_v50 = vmul.f32 %v2485_v54, %v2155_v41  ;;  %v719_v51 = vmul.f32 %v2513_v7, %v2155_v41 }
 0x156   :  { %1192 = vadd.xlane.f32.xlu0 %v1191_v14  ;;  %1195 = vadd.xlane.f32.xlu1 %v1194_v48  ;;  %v1039_v14 = vmul.f32 %v2433_v24, %v2157_v42  ;;  %v1040_v48 = vmul.f32 %v2453_v28, %v2157_v42  ;;  %v776_v28 = vsel %vm273_vm0, %v680_v27, 0.0 }
 0x158   :  { %v1203_v23 = vsel %vm273_vm0, %v1039_v14, 0.0  ;;  %v1206_v62 = vsel %vm273_vm0, %v1040_v48, 0.0  ;;  %v890_v14 = vsel %vm273_vm0, %v718_v50, 0.0  ;;  %v893_v48 = vsel %vm273_vm0, %v719_v51, 0.0 }
 0x159   :  { %v722_v50 = vmul.f32 %v2629_v22, %v2155_v41  ;;  %v723_v51 = vmul.f32 %v2647_v37, %v2155_v41 }
 0x15a   :  { %765 = vadd.xlane.f32.xlu0 %v764_v2  ;;  %768 = vadd.xlane.f32.xlu1 %v767_v56  ;;  %v779_v56 = vsel %vm273_vm0, %v681_v55, 0.0 }
 0x15e   :  { %861 = vadd.xlane.f32.xlu0 %v860_v58  ;;  %864 = vadd.xlane.f32.xlu1 %v863_v12 }
 0x162   :  { %1090 = vadd.xlane.f32.xlu0 %v1089_v16  ;;  %1093 = vadd.xlane.f32.xlu1 %v1092_v17  ;;  %v1005_v16 = vmul.f32 %v2157_v42, %v2439_v25  ;;  %v1006_v17 = vmul.f32 %v2157_v42, %v2461_v39  ;;  %v1037_v39 = vmul.f32 %v2157_v42, %v2441_v26 }
 0x164   :  { %v1104_v25 = vsel %vm273_vm0, %v1006_v17, 0.0  ;;  %v717_v17 = vmul.f32 %v2155_v41, %v2531_v15 }
 0x166   :  { %1186 = vadd.xlane.f32.xlu0 %v1185_v19  ;;  %1189 = vadd.xlane.f32.xlu1 %v1188_v57  ;;  %v1101_v19 = vsel %vm273_vm0, %v1005_v16, 0.0  ;;  %v1038_v57 = vmul.f32 %v2157_v42, %v2463_v40  ;;  %v686_v40 = vmul.f32 %v2483_v53, %v2155_v41  ;;  %v716_v16 = vmul.f32 %v2155_v41, %v2497_v0 }
 0x168   :  { %v1200_v26 = vsel %vm273_vm0, %v1038_v57, 0.0  ;;  %v1010_v57 = vmul.f32 %v2157_v42, %v2529_v13  ;;  %v1041_v13 = vmul.f32 %v2157_v42, %v2497_v0 }
 0x16a   :  { %783 = vadd.xlane.f32.xlu0 %v782_v38  ;;  %786 = vadd.xlane.f32.xlu1 %v785_v60  ;;  %v1197_v38 = vsel %vm273_vm0, %v1037_v39, 0.0  ;;  %v687_v60 = vmul.f32 %v2511_v59, %v2155_v41  ;;  %v1009_v39 = vmul.f32 %v2157_v42, %v2495_v61  ;;  %v1116_v61 = vsel %vm273_vm0, %v1010_v57, 0.0 }
 0x16e   :  { %879 = vadd.xlane.f32.xlu0 %v878_v46  ;;  %882 = vadd.xlane.f32.xlu1 %v881_v47  ;;  %v794_v46 = vsel %vm273_vm0, %v686_v40, 0.0  ;;  %v797_v47 = vsel %vm273_vm0, %v687_v60, 0.0 }
 0x172   :  { %1108 = vadd.xlane.f32.xlu0 %v1107_v31  ;;  %1111 = vadd.xlane.f32.xlu1 %v1110_v52 }
 0x176   :  { %1204 = vadd.xlane.f32.xlu0 %v1203_v23  ;;  %1207 = vadd.xlane.f32.xlu1 %v1206_v62  ;;  %v1011_v23 = vmul.f32 %v2483_v53, %v2157_v42  ;;  %v1012_v62 = vmul.f32 %v2511_v59, %v2157_v42  ;;  %v1044_v53 = vmul.f32 %v2513_v7, %v2157_v42 }
 0x177   :  { %v832_v2 = vpop.xlane.xlu0 %831  ;;  %v736_v24 = vpop.xlane.xlu1 %735 }
 0x178   :  { %955 = vst.msk [vmem:[%s3547_s4 + $0x110] sm:$0xff] %vm920_vm2, %v832_v2  ;;  %923 = vst.msk [vmem:[%s3547_s4 + $0x10] sm:$0xff] %vm920_vm2, %v736_v24  ;;  %v1119_v2 = vsel %vm273_vm0, %v1011_v23, 0.0  ;;  %v1122_v24 = vsel %vm273_vm0, %v1012_v62, 0.0  ;;  %v1218_v7 = vsel %vm273_vm0, %v1044_v53, 0.0  ;;  %v1015_v23 = vmul.f32 %v2607_v1, %v2157_v42 }
 0x179   :  { %v1016_v62 = vmul.f32 %v2627_v10, %v2157_v42 }
 0x17a   :  { %777 = vadd.xlane.f32.xlu0 %v776_v28  ;;  %780 = vadd.xlane.f32.xlu1 %v779_v56  ;;  %v1043_v28 = vmul.f32 %v2485_v54, %v2157_v42 }
 0x17b   :  { %v1061_v58 = vpop.xlane.xlu0 %1060  ;;  %v739_v12 = vpop.xlane.xlu1 %738  ;;  %v1134_v53 = vsel %vm273_vm0, %v1016_v62, 0.0 }
 0x17c   :  { %1248 = vst.msk [vmem:[%s3547_s4 + $0x10] sm:$0xff] %vm1245_vm3, %v1061_v58  ;;  %v1215_v54 = vsel %vm273_vm0, %v1043_v28, 0.0  ;;  %v1131_v28 = vsel %vm273_vm0, %v1015_v23, 0.0 }
 0x17d   :  { %924 = vst.msk [vmem:[%s3547_s4 + $0x18] sm:$0xff] %vm920_vm2, %v739_v12 }
 0x17e   :  { %873 = vadd.xlane.f32.xlu0 %v872_v29  ;;  %876 = vadd.xlane.f32.xlu1 %v875_v35  ;;  %v788_v29 = vsel %vm273_vm0, %v684_v63, 0.0  ;;  %v791_v35 = vsel %vm273_vm0, %v685_v9, 0.0 }
 0x17f   :  { %v1157_v36 = vpop.xlane.xlu0 %1156  ;;  %v835_v18 = vpop.xlane.xlu1 %834 }
 0x180   :  { %1280 = vst.msk [vmem:[%s3547_s4 + $0x110] sm:$0xff] %vm1245_vm3, %v1157_v36 }
 0x181   :  { %956 = vst.msk [vmem:[%s3547_s4 + $0x118] sm:$0xff] %vm920_vm2, %v835_v18 }
 0x182   :  { %1102 = vadd.xlane.f32.xlu0 %v1101_v19  ;;  %1105 = vadd.xlane.f32.xlu1 %v1104_v25  ;;  %v884_v19 = vsel %vm273_vm0, %v716_v16, 0.0  ;;  %v887_v25 = vsel %vm273_vm0, %v717_v17, 0.0 }
 0x183   :  { %v730_v3 = vpop.xlane.xlu0 %729  ;;  %v1064_v34 = vpop.xlane.xlu1 %1063 }
 0x184   :  { %921 = vst.msk [vmem:[%s3547_s4] sm:$0xff] %vm920_vm2, %v730_v3 }
 0x185   :  { %1249 = vst.msk [vmem:[%s3547_s4 + $0x18] sm:$0xff] %vm1245_vm3, %v1064_v34 }
 0x186   :  { %1198 = vadd.xlane.f32.xlu0 %v1197_v38  ;;  %1201 = vadd.xlane.f32.xlu1 %v1200_v26  ;;  %v1113_v38 = vsel %vm273_vm0, %v1009_v39, 0.0  ;;  %v1042_v26 = vmul.f32 %v2157_v42, %v2531_v15  ;;  %v690_v15 = vmul.f32 %v2607_v1, %v2155_v41  ;;  %v1047_v1 = vmul.f32 %v2629_v22, %v2157_v42 }
 0x187   :  { %v826_v4 = vpop.xlane.xlu0 %825  ;;  %v1160_v45 = vpop.xlane.xlu1 %1159  ;;  %v688_v22 = vmul.f32 %v2155_v41, %v2617_v11 }
 0x188   :  { %953 = vst.msk [vmem:[%s3547_s4 + $0x100] sm:$0xff] %vm920_vm2, %v826_v4  ;;  %v1209_v4 = vsel %vm273_vm0, %v1041_v13, 0.0  ;;  %v1212_v0 = vsel %vm273_vm0, %v1042_v26, 0.0 }
 0x189   :  { %1281 = vst.msk [vmem:[%s3547_s4 + $0x118] sm:$0xff] %vm1245_vm3, %v1160_v45  ;;  %v691_v45 = vmul.f32 %v2627_v10, %v2155_v41  ;;  %v1048_v10 = vmul.f32 %v2647_v37, %v2157_v42  ;;  %v689_v37 = vmul.f32 %v2155_v41, %v2641_v21 }
 0x18a   :  { %795 = vadd.xlane.f32.xlu0 %v794_v46  ;;  %798 = vadd.xlane.f32.xlu1 %v797_v47 }
 0x18b   :  { %v1055_v31 = vpop.xlane.xlu0 %1054  ;;  %v829_v52 = vpop.xlane.xlu1 %828 }
 0x18c   :  { %1246 = vst.msk [vmem:[%s3547_s4] sm:$0xff] %vm1245_vm3, %v1055_v31  ;;  %v806_v31 = vsel %vm273_vm0, %v690_v15, 0.0 }
 0x18d   :  { %954 = vst.msk [vmem:[%s3547_s4 + $0x108] sm:$0xff] %vm920_vm2, %v829_v52  ;;  %v809_v52 = vsel %vm273_vm0, %v691_v45, 0.0 }
 0x18e   :  { %891 = vadd.xlane.f32.xlu0 %v890_v14  ;;  %894 = vadd.xlane.f32.xlu1 %v893_v48 }
 0x18f   :  { %v1151_v27 = vpop.xlane.xlu0 %1150  ;;  %v1058_v55 = vpop.xlane.xlu1 %1057 }
 0x190   :  { %1278 = vst.msk [vmem:[%s3547_s4 + $0x100] sm:$0xff] %vm1245_vm3, %v1151_v27  ;;  %v902_v27 = vsel %vm273_vm0, %v722_v50, 0.0  ;;  %v1019_v50 = vmul.f32 %v2725_v5, %v2157_v42 }
 0x192   :  { %1120 = vadd.xlane.f32.xlu0 %v1119_v2  ;;  %1123 = vadd.xlane.f32.xlu1 %v1122_v24  ;;  %v1143_v23 = vsel %vm273_vm0, %v1019_v50, 0.0 }
 0x193   :  { %v1154_v59 = vpop.xlane.xlu1 %1153  ;;  %v733_v56 = vpop.xlane.xlu0 %732 }
 0x194   :  { %1279 = vst.msk [vmem:[%s3547_s4 + $0x108] sm:$0xff] %vm1245_vm3, %v1154_v59 }
 0x195   :  { %922 = vst.msk [vmem:[%s3547_s4 + $0x8] sm:$0xff] %vm920_vm2, %v733_v56 }
 0x196   :  { %1247 = vst.msk [vmem:[%s3547_s4 + $0x8] sm:$0xff] %vm1245_vm3, %v1058_v55  ;;  %1216 = vadd.xlane.f32.xlu0 %v1215_v54  ;;  %1219 = vadd.xlane.f32.xlu1 %v1218_v7  ;;  %v905_v55 = vsel %vm273_vm0, %v723_v51, 0.0  ;;  %v1227_v54 = vsel %vm273_vm0, %v1047_v1, 0.0  ;;  %v1230_v7 = vsel %vm273_vm0, %v1048_v10, 0.0  ;;  %v1020_v51 = vmul.f32 %v2739_v32, %v2157_v42 }
 0x197   :  { %v748_v58 = vpop.xlane.xlu0 %747  ;;  %v751_v12 = vpop.xlane.xlu1 %750 }
 0x198   :  { %927 = vst.msk [vmem:[%s3547_s4 + $0x30] sm:$0xff] %vm920_vm2, %v748_v58  ;;  %928 = vst.msk [vmem:[%s3547_s4 + $0x38] sm:$0xff] %vm920_vm2, %v751_v12  ;;  %v720_v58 = vmul.f32 %v2155_v41, %v2643_v33  ;;  %v721_v12 = vmul.f32 %v2155_v41, %v2665_v49  ;;  %v1146_v62 = vsel %vm273_vm0, %v1020_v51, 0.0 }
 0x19a   :  { %789 = vadd.xlane.f32.xlu0 %v788_v29  ;;  %792 = vadd.xlane.f32.xlu1 %v791_v35  ;;  %v800_v29 = vsel %vm273_vm0, %v688_v22, 0.0  ;;  %v803_v35 = vsel %vm273_vm0, %v689_v37, 0.0 }
 0x19b   :  { %v844_v36 = vpop.xlane.xlu0 %843  ;;  %v847_v18 = vpop.xlane.xlu1 %846 }
 0x19c   :  { %959 = vst.msk [vmem:[%s3547_s4 + $0x130] sm:$0xff] %vm920_vm2, %v844_v36  ;;  %960 = vst.msk [vmem:[%s3547_s4 + $0x138] sm:$0xff] %vm920_vm2, %v847_v18  ;;  %v1013_v36 = vmul.f32 %v2157_v42, %v2617_v11  ;;  %v1014_v18 = vmul.f32 %v2157_v42, %v2641_v21  ;;  %v1045_v11 = vmul.f32 %v2157_v42, %v2643_v33 }
 0x19d   :  { %v1046_v21 = vmul.f32 %v2157_v42, %v2665_v49  ;;  %v694_v33 = vmul.f32 %v2725_v5, %v2155_v41  ;;  %v695_v49 = vmul.f32 %v2739_v32, %v2155_v41  ;;  %v692_v5 = vmul.f32 %v2155_v41, %v2729_v43 }
 0x19e   :  { %885 = vadd.xlane.f32.xlu0 %v884_v19  ;;  %888 = vadd.xlane.f32.xlu1 %v887_v25  ;;  %v896_v19 = vsel %vm273_vm0, %v720_v58, 0.0  ;;  %v899_v25 = vsel %vm273_vm0, %v721_v12, 0.0  ;;  %v1221_v13 = vsel %vm273_vm0, %v1045_v11, 0.0  ;;  %v693_v32 = vmul.f32 %v2155_v41, %v2753_v8 }
 0x19f   :  { %v1073_v3 = vpop.xlane.xlu0 %1072  ;;  %v1076_v34 = vpop.xlane.xlu1 %1075  ;;  %v1224_v26 = vsel %vm273_vm0, %v1046_v21, 0.0  ;;  %v818_v15 = vsel %vm273_vm0, %v694_v33, 0.0  ;;  %v821_v45 = vsel %vm273_vm0, %v695_v49, 0.0  ;;  %v812_v1 = vsel %vm273_vm0, %v692_v5, 0.0 }
 0x1a0   :  { %1252 = vst.msk [vmem:[%s3547_s4 + $0x30] sm:$0xff] %vm1245_vm3, %v1073_v3  ;;  %1253 = vst.msk [vmem:[%s3547_s4 + $0x38] sm:$0xff] %vm1245_vm3, %v1076_v34  ;;  %v1125_v3 = vsel %vm273_vm0, %v1013_v36, 0.0  ;;  %v1128_v34 = vsel %vm273_vm0, %v1014_v18, 0.0  ;;  %v815_v10 = vsel %vm273_vm0, %v693_v32, 0.0 }
 0x1a2   :  { %1114 = vadd.xlane.f32.xlu0 %v1113_v38  ;;  %1117 = vadd.xlane.f32.xlu1 %v1116_v61 }
 0x1a3   :  { %v1169_v40 = vpop.xlane.xlu0 %1168  ;;  %v1172_v60 = vpop.xlane.xlu1 %1171 }
 0x1a4   :  { %1284 = vst.msk [vmem:[%s3547_s4 + $0x130] sm:$0xff] %vm1245_vm3, %v1169_v40  ;;  %1285 = vst.msk [vmem:[%s3547_s4 + $0x138] sm:$0xff] %vm1245_vm3, %v1172_v60 }
 0x1a6   :  { %1210 = vadd.xlane.f32.xlu0 %v1209_v4  ;;  %1213 = vadd.xlane.f32.xlu1 %v1212_v0  ;;  %v726_v4 = vmul.f32 %v2741_v44, %v2155_v41  ;;  %v727_v0 = vmul.f32 %v2759_v6, %v2155_v41 }
 0x1a7   :  { %v742_v46 = vpop.xlane.xlu0 %741  ;;  %v745_v47 = vpop.xlane.xlu1 %744 }
 0x1a8   :  { %925 = vst.msk [vmem:[%s3547_s4 + $0x20] sm:$0xff] %vm920_vm2, %v742_v46  ;;  %926 = vst.msk [vmem:[%s3547_s4 + $0x28] sm:$0xff] %vm920_vm2, %v745_v47 }
 0x1aa   :  { %807 = vadd.xlane.f32.xlu0 %v806_v31  ;;  %810 = vadd.xlane.f32.xlu1 %v809_v52  ;;  %v914_v31 = vsel %vm273_vm0, %v726_v4, 0.0  ;;  %v917_v52 = vsel %vm273_vm0, %v727_v0, 0.0 }
 0x1ab   :  { %v838_v14 = vpop.xlane.xlu0 %837  ;;  %v841_v48 = vpop.xlane.xlu1 %840 }
 0x1ac   :  { %957 = vst.msk [vmem:[%s3547_s4 + $0x120] sm:$0xff] %vm920_vm2, %v838_v14  ;;  %958 = vst.msk [vmem:[%s3547_s4 + $0x128] sm:$0xff] %vm920_vm2, %v841_v48 }
 0x1ae   :  { %903 = vadd.xlane.f32.xlu0 %v902_v27  ;;  %906 = vadd.xlane.f32.xlu1 %v905_v55 }
 0x1af   :  { %v1067_v2 = vpop.xlane.xlu0 %1066  ;;  %v1070_v24 = vpop.xlane.xlu1 %1069 }
 0x1b0   :  { %1250 = vst.msk [vmem:[%s3547_s4 + $0x20] sm:$0xff] %vm1245_vm3, %v1067_v2  ;;  %1251 = vst.msk [vmem:[%s3547_s4 + $0x28] sm:$0xff] %vm1245_vm3, %v1070_v24  ;;  %v724_v2 = vmul.f32 %v2155_v41, %v2755_v20  ;;  %v725_v24 = vmul.f32 %v2155_v41, %v2777_v30  ;;  %v1017_v41 = vmul.f32 %v2157_v42, %v2729_v43 }
 0x1b1   :  { %v1049_v43 = vmul.f32 %v2157_v42, %v2755_v20  ;;  %v1051_v20 = vmul.f32 %v2741_v44, %v2157_v42 }
 0x1b2   :  { %1132 = vadd.xlane.f32.xlu0 %v1131_v28  ;;  %1135 = vadd.xlane.f32.xlu1 %v1134_v53  ;;  %v911_v22 = vsel %vm273_vm0, %v725_v24, 0.0 }
 0x1b3   :  { %v1163_v59 = vpop.xlane.xlu0 %1162  ;;  %v1166_v56 = vpop.xlane.xlu1 %1165  ;;  %v1233_v12 = vsel %vm273_vm0, %v1049_v43, 0.0 }
 0x1b4   :  { %1282 = vst.msk [vmem:[%s3547_s4 + $0x120] sm:$0xff] %vm1245_vm3, %v1163_v59  ;;  %1283 = vst.msk [vmem:[%s3547_s4 + $0x128] sm:$0xff] %vm1245_vm3, %v1166_v56  ;;  %v1018_v59 = vmul.f32 %v2157_v42, %v2753_v8  ;;  %v908_v56 = vsel %vm273_vm0, %v724_v2, 0.0  ;;  %v1050_v8 = vmul.f32 %v2157_v42, %v2777_v30  ;;  %v1052_v30 = vmul.f32 %v2759_v6, %v2157_v42 }
 0x1b5   :  { %v1239_v42 = vsel %vm273_vm0, %v1051_v20, 0.0 }
 0x1b6   :  { %1228 = vadd.xlane.f32.xlu0 %v1227_v54  ;;  %1231 = vadd.xlane.f32.xlu1 %v1230_v7  ;;  %v1137_v7 = vsel %vm273_vm0, %v1017_v41, 0.0  ;;  %v1242_v44 = vsel %vm273_vm0, %v1052_v30, 0.0 }
 0x1b7   :  { %v760_v63 = vpop.xlane.xlu0 %759  ;;  %v763_v9 = vpop.xlane.xlu1 %762 }
 0x1b8   :  { %931 = vst.msk [vmem:[%s3547_s4 + $0x50] sm:$0xff] %vm920_vm2, %v760_v63  ;;  %932 = vst.msk [vmem:[%s3547_s4 + $0x58] sm:$0xff] %vm920_vm2, %v763_v9  ;;  %v1140_v63 = vsel %vm273_vm0, %v1018_v59, 0.0 }
 0x1ba   :  { %801 = vadd.xlane.f32.xlu0 %v800_v29  ;;  %804 = vadd.xlane.f32.xlu1 %v803_v35  ;;  %v1236_v29 = vsel %vm273_vm0, %v1050_v8, 0.0 }
 0x1bb   :  { %v856_v16 = vpop.xlane.xlu0 %855  ;;  %v859_v17 = vpop.xlane.xlu1 %858 }
 0x1bc   :  { %963 = vst.msk [vmem:[%s3547_s4 + $0x150] sm:$0xff] %vm920_vm2, %v856_v16  ;;  %964 = vst.msk [vmem:[%s3547_s4 + $0x158] sm:$0xff] %vm920_vm2, %v859_v17 }
 0x1be   :  { %897 = vadd.xlane.f32.xlu0 %v896_v19  ;;  %900 = vadd.xlane.f32.xlu1 %v899_v25 }
 0x1bf   :  { %v1085_v39 = vpop.xlane.xlu0 %1084  ;;  %v1088_v57 = vpop.xlane.xlu1 %1087 }
 0x1c0   :  { %1256 = vst.msk [vmem:[%s3547_s4 + $0x50] sm:$0xff] %vm1245_vm3, %v1085_v39  ;;  %1257 = vst.msk [vmem:[%s3547_s4 + $0x58] sm:$0xff] %vm1245_vm3, %v1088_v57 }
 0x1c2   :  { %1126 = vadd.xlane.f32.xlu0 %v1125_v3  ;;  %1129 = vadd.xlane.f32.xlu1 %v1128_v34 }
 0x1c3   :  { %v1181_v38 = vpop.xlane.xlu0 %1180  ;;  %v1184_v61 = vpop.xlane.xlu1 %1183 }
 0x1c4   :  { %1288 = vst.msk [vmem:[%s3547_s4 + $0x150] sm:$0xff] %vm1245_vm3, %v1181_v38  ;;  %1289 = vst.msk [vmem:[%s3547_s4 + $0x158] sm:$0xff] %vm1245_vm3, %v1184_v61 }
 0x1c6   :  { %1222 = vadd.xlane.f32.xlu0 %v1221_v13  ;;  %1225 = vadd.xlane.f32.xlu1 %v1224_v26 }
 0x1c7   :  { %v754_v40 = vpop.xlane.xlu0 %753  ;;  %v757_v60 = vpop.xlane.xlu1 %756 }
 0x1c8   :  { %929 = vst.msk [vmem:[%s3547_s4 + $0x40] sm:$0xff] %vm920_vm2, %v754_v40  ;;  %930 = vst.msk [vmem:[%s3547_s4 + $0x48] sm:$0xff] %vm920_vm2, %v757_v60 }
 0x1ca   :  { %819 = vadd.xlane.f32.xlu0 %v818_v15  ;;  %822 = vadd.xlane.f32.xlu1 %v821_v45 }
 0x1cb   :  { %v850_v46 = vpop.xlane.xlu0 %849  ;;  %v853_v47 = vpop.xlane.xlu1 %852 }
 0x1cc   :  { %961 = vst.msk [vmem:[%s3547_s4 + $0x140] sm:$0xff] %vm920_vm2, %v850_v46  ;;  %962 = vst.msk [vmem:[%s3547_s4 + $0x148] sm:$0xff] %vm920_vm2, %v853_v47 }
 0x1ce   :  { %915 = vadd.xlane.f32.xlu0 %v914_v31  ;;  %918 = vadd.xlane.f32.xlu1 %v917_v52 }
 0x1cf   :  { %v1079_v14 = vpop.xlane.xlu0 %1078  ;;  %v1082_v48 = vpop.xlane.xlu1 %1081 }
 0x1d0   :  { %1254 = vst.msk [vmem:[%s3547_s4 + $0x40] sm:$0xff] %vm1245_vm3, %v1079_v14  ;;  %1255 = vst.msk [vmem:[%s3547_s4 + $0x48] sm:$0xff] %vm1245_vm3, %v1082_v48 }
 0x1d2   :  { %1144 = vadd.xlane.f32.xlu0 %v1143_v23  ;;  %1147 = vadd.xlane.f32.xlu1 %v1146_v62 }
 0x1d3   :  { %v1175_v27 = vpop.xlane.xlu0 %1174  ;;  %v1178_v55 = vpop.xlane.xlu1 %1177 }
 0x1d4   :  { %1286 = vst.msk [vmem:[%s3547_s4 + $0x140] sm:$0xff] %vm1245_vm3, %v1175_v27  ;;  %1287 = vst.msk [vmem:[%s3547_s4 + $0x148] sm:$0xff] %vm1245_vm3, %v1178_v55 }
 0x1d6   :  { %813 = vadd.xlane.f32.xlu0 %v812_v1  ;;  %816 = vadd.xlane.f32.xlu1 %v815_v10 }
 0x1d7   :  { %v772_v28 = vpop.xlane.xlu0 %771  ;;  %v775_v53 = vpop.xlane.xlu1 %774 }
 0x1d8   :  { %935 = vst.msk [vmem:[%s3547_s4 + $0x70] sm:$0xff] %vm920_vm2, %v772_v28  ;;  %936 = vst.msk [vmem:[%s3547_s4 + $0x78] sm:$0xff] %vm920_vm2, %v775_v53 }
 0x1da   :  { %909 = vadd.xlane.f32.xlu0 %v908_v56  ;;  %912 = vadd.xlane.f32.xlu1 %v911_v22 }
 0x1db   :  { %v868_v37 = vpop.xlane.xlu0 %867  ;;  %v871_v54 = vpop.xlane.xlu1 %870 }
 0x1dc   :  { %967 = vst.msk [vmem:[%s3547_s4 + $0x170] sm:$0xff] %vm920_vm2, %v868_v37  ;;  %968 = vst.msk [vmem:[%s3547_s4 + $0x178] sm:$0xff] %vm920_vm2, %v871_v54 }
 0x1de   :  { %1138 = vadd.xlane.f32.xlu0 %v1137_v7  ;;  %1141 = vadd.xlane.f32.xlu1 %v1140_v63 }
 0x1df   :  { %v1097_v9 = vpop.xlane.xlu0 %1096  ;;  %v1100_v58 = vpop.xlane.xlu1 %1099 }
 0x1e0   :  { %1260 = vst.msk [vmem:[%s3547_s4 + $0x70] sm:$0xff] %vm1245_vm3, %v1097_v9  ;;  %1261 = vst.msk [vmem:[%s3547_s4 + $0x78] sm:$0xff] %vm1245_vm3, %v1100_v58 }
 0x1e2   :  { %1234 = vadd.xlane.f32.xlu0 %v1233_v12  ;;  %1237 = vadd.xlane.f32.xlu1 %v1236_v29 }
 0x1e3   :  { %v1193_v35 = vpop.xlane.xlu0 %1192  ;;  %v1196_v16 = vpop.xlane.xlu1 %1195 }
 0x1e4   :  { %1292 = vst.msk [vmem:[%s3547_s4 + $0x170] sm:$0xff] %vm1245_vm3, %v1193_v35  ;;  %1293 = vst.msk [vmem:[%s3547_s4 + $0x178] sm:$0xff] %vm1245_vm3, %v1196_v16 }
 0x1e6   :  { %1240 = vadd.xlane.f32.xlu0 %v1239_v42  ;;  %1243 = vadd.xlane.f32.xlu1 %v1242_v44 }
 0x1e7   :  { %v766_v6 = vpop.xlane.xlu0 %765  ;;  %v769_v17 = vpop.xlane.xlu1 %768 }
 0x1e8   :  { %933 = vst.msk [vmem:[%s3547_s4 + $0x60] sm:$0xff] %vm920_vm2, %v766_v6  ;;  %934 = vst.msk [vmem:[%s3547_s4 + $0x68] sm:$0xff] %vm920_vm2, %v769_v17 }
 0x1eb   :  { %v862_v36 = vpop.xlane.xlu0 %861  ;;  %v865_v18 = vpop.xlane.xlu1 %864 }
 0x1ec   :  { %965 = vst.msk [vmem:[%s3547_s4 + $0x160] sm:$0xff] %vm920_vm2, %v862_v36  ;;  %966 = vst.msk [vmem:[%s3547_s4 + $0x168] sm:$0xff] %vm920_vm2, %v865_v18 }
 0x1ef   :  { %v1091_v19 = vpop.xlane.xlu0 %1090  ;;  %v1094_v25 = vpop.xlane.xlu1 %1093 }
 0x1f0   :  { %1258 = vst.msk [vmem:[%s3547_s4 + $0x60] sm:$0xff] %vm1245_vm3, %v1091_v19  ;;  %1259 = vst.msk [vmem:[%s3547_s4 + $0x68] sm:$0xff] %vm1245_vm3, %v1094_v25 }
 0x1f3   :  { %v1187_v39 = vpop.xlane.xlu0 %1186  ;;  %v1190_v57 = vpop.xlane.xlu1 %1189 }
 0x1f4   :  { %1290 = vst.msk [vmem:[%s3547_s4 + $0x160] sm:$0xff] %vm1245_vm3, %v1187_v39  ;;  %1291 = vst.msk [vmem:[%s3547_s4 + $0x168] sm:$0xff] %vm1245_vm3, %v1190_v57 }
 0x1f7   :  { %v784_v11 = vpop.xlane.xlu0 %783  ;;  %v787_v21 = vpop.xlane.xlu1 %786 }
 0x1f8   :  { %939 = vst.msk [vmem:[%s3547_s4 + $0x90] sm:$0xff] %vm920_vm2, %v784_v11  ;;  %940 = vst.msk [vmem:[%s3547_s4 + $0x98] sm:$0xff] %vm920_vm2, %v787_v21 }
 0x1fb   :  { %v880_v3 = vpop.xlane.xlu0 %879  ;;  %v883_v34 = vpop.xlane.xlu1 %882 }
 0x1fc   :  { %971 = vst.msk [vmem:[%s3547_s4 + $0x190] sm:$0xff] %vm920_vm2, %v880_v3  ;;  %972 = vst.msk [vmem:[%s3547_s4 + $0x198] sm:$0xff] %vm920_vm2, %v883_v34 }
 0x1ff   :  { %v1109_v38 = vpop.xlane.xlu0 %1108  ;;  %v1112_v61 = vpop.xlane.xlu1 %1111 }
 0x200   :  { %1264 = vst.msk [vmem:[%s3547_s4 + $0x90] sm:$0xff] %vm1245_vm3, %v1109_v38  ;;  %1265 = vst.msk [vmem:[%s3547_s4 + $0x98] sm:$0xff] %vm1245_vm3, %v1112_v61 }
 0x203   :  { %v1205_v33 = vpop.xlane.xlu0 %1204  ;;  %v1208_v49 = vpop.xlane.xlu1 %1207 }
 0x204   :  { %1296 = vst.msk [vmem:[%s3547_s4 + $0x190] sm:$0xff] %vm1245_vm3, %v1205_v33  ;;  %1297 = vst.msk [vmem:[%s3547_s4 + $0x198] sm:$0xff] %vm1245_vm3, %v1208_v49 }
 0x207   :  { %v778_v13 = vpop.xlane.xlu0 %777  ;;  %v781_v26 = vpop.xlane.xlu1 %780 }
 0x208   :  { %937 = vst.msk [vmem:[%s3547_s4 + $0x80] sm:$0xff] %vm920_vm2, %v778_v13  ;;  %938 = vst.msk [vmem:[%s3547_s4 + $0x88] sm:$0xff] %vm920_vm2, %v781_v26 }
 0x20b   :  { %v874_v40 = vpop.xlane.xlu0 %873  ;;  %v877_v60 = vpop.xlane.xlu1 %876 }
 0x20c   :  { %969 = vst.msk [vmem:[%s3547_s4 + $0x180] sm:$0xff] %vm920_vm2, %v874_v40  ;;  %970 = vst.msk [vmem:[%s3547_s4 + $0x188] sm:$0xff] %vm920_vm2, %v877_v60 }
 0x20f   :  { %v1103_v4 = vpop.xlane.xlu0 %1102  ;;  %v1106_v0 = vpop.xlane.xlu1 %1105 }
 0x210   :  { %1262 = vst.msk [vmem:[%s3547_s4 + $0x80] sm:$0xff] %vm1245_vm3, %v1103_v4  ;;  %1263 = vst.msk [vmem:[%s3547_s4 + $0x88] sm:$0xff] %vm1245_vm3, %v1106_v0 }
 0x213   :  { %v1199_v15 = vpop.xlane.xlu0 %1198  ;;  %v1202_v45 = vpop.xlane.xlu1 %1201 }
 0x214   :  { %1294 = vst.msk [vmem:[%s3547_s4 + $0x180] sm:$0xff] %vm1245_vm3, %v1199_v15  ;;  %1295 = vst.msk [vmem:[%s3547_s4 + $0x188] sm:$0xff] %vm1245_vm3, %v1202_v45 }
 0x217   :  { %v796_v46 = vpop.xlane.xlu0 %795  ;;  %v799_v47 = vpop.xlane.xlu1 %798 }
 0x218   :  { %943 = vst.msk [vmem:[%s3547_s4 + $0xb0] sm:$0xff] %vm920_vm2, %v796_v46  ;;  %944 = vst.msk [vmem:[%s3547_s4 + $0xb8] sm:$0xff] %vm920_vm2, %v799_v47 }
 0x21b   :  { %v892_v50 = vpop.xlane.xlu0 %891  ;;  %v895_v51 = vpop.xlane.xlu1 %894 }
 0x21c   :  { %975 = vst.msk [vmem:[%s3547_s4 + $0x1b0] sm:$0xff] %vm920_vm2, %v892_v50  ;;  %976 = vst.msk [vmem:[%s3547_s4 + $0x1b8] sm:$0xff] %vm920_vm2, %v895_v51 }
 0x21f   :  { %v1121_v31 = vpop.xlane.xlu0 %1120  ;;  %v1124_v52 = vpop.xlane.xlu1 %1123 }
 0x220   :  { %1268 = vst.msk [vmem:[%s3547_s4 + $0xb0] sm:$0xff] %vm1245_vm3, %v1121_v31  ;;  %1269 = vst.msk [vmem:[%s3547_s4 + $0xb8] sm:$0xff] %vm1245_vm3, %v1124_v52 }
 0x223   :  { %v1217_v14 = vpop.xlane.xlu0 %1216  ;;  %v1220_v48 = vpop.xlane.xlu1 %1219 }
 0x224   :  { %1300 = vst.msk [vmem:[%s3547_s4 + $0x1b0] sm:$0xff] %vm1245_vm3, %v1217_v14  ;;  %1301 = vst.msk [vmem:[%s3547_s4 + $0x1b8] sm:$0xff] %vm1245_vm3, %v1220_v48 }
 0x227   :  { %v790_v5 = vpop.xlane.xlu0 %789  ;;  %v793_v32 = vpop.xlane.xlu1 %792 }
 0x228   :  { %941 = vst.msk [vmem:[%s3547_s4 + $0xa0] sm:$0xff] %vm920_vm2, %v790_v5  ;;  %942 = vst.msk [vmem:[%s3547_s4 + $0xa8] sm:$0xff] %vm920_vm2, %v793_v32 }
 0x22b   :  { %v886_v23 = vpop.xlane.xlu0 %885  ;;  %v889_v62 = vpop.xlane.xlu1 %888 }
 0x22c   :  { %973 = vst.msk [vmem:[%s3547_s4 + $0x1a0] sm:$0xff] %vm920_vm2, %v886_v23  ;;  %974 = vst.msk [vmem:[%s3547_s4 + $0x1a8] sm:$0xff] %vm920_vm2, %v889_v62 }
 0x22f   :  { %v1115_v27 = vpop.xlane.xlu0 %1114  ;;  %v1118_v55 = vpop.xlane.xlu1 %1117 }
 0x230   :  { %1266 = vst.msk [vmem:[%s3547_s4 + $0xa0] sm:$0xff] %vm1245_vm3, %v1115_v27  ;;  %1267 = vst.msk [vmem:[%s3547_s4 + $0xa8] sm:$0xff] %vm1245_vm3, %v1118_v55 }
 0x233   :  { %v1211_v2 = vpop.xlane.xlu0 %1210  ;;  %v1214_v24 = vpop.xlane.xlu1 %1213 }
 0x234   :  { %1298 = vst.msk [vmem:[%s3547_s4 + $0x1a0] sm:$0xff] %vm1245_vm3, %v1211_v2  ;;  %1299 = vst.msk [vmem:[%s3547_s4 + $0x1a8] sm:$0xff] %vm1245_vm3, %v1214_v24 }
 0x237   :  { %v808_v1 = vpop.xlane.xlu0 %807  ;;  %v811_v10 = vpop.xlane.xlu1 %810 }
 0x238   :  { %947 = vst.msk [vmem:[%s3547_s4 + $0xd0] sm:$0xff] %vm920_vm2, %v808_v1  ;;  %948 = vst.msk [vmem:[%s3547_s4 + $0xd8] sm:$0xff] %vm920_vm2, %v811_v10 }
 0x23b   :  { %v904_v28 = vpop.xlane.xlu0 %903  ;;  %v907_v53 = vpop.xlane.xlu1 %906 }
 0x23c   :  { %979 = vst.msk [vmem:[%s3547_s4 + $0x1d0] sm:$0xff] %vm920_vm2, %v904_v28  ;;  %980 = vst.msk [vmem:[%s3547_s4 + $0x1d8] sm:$0xff] %vm920_vm2, %v907_v53 }
 0x23f   :  { %v1133_v41 = vpop.xlane.xlu0 %1132  ;;  %v1136_v59 = vpop.xlane.xlu1 %1135 }
 0x240   :  { %1272 = vst.msk [vmem:[%s3547_s4 + $0xd0] sm:$0xff] %vm1245_vm3, %v1133_v41  ;;  %1273 = vst.msk [vmem:[%s3547_s4 + $0xd8] sm:$0xff] %vm1245_vm3, %v1136_v59 }
 0x243   :  { %v1229_v56 = vpop.xlane.xlu0 %1228  ;;  %v1232_v22 = vpop.xlane.xlu1 %1231 }
 0x244   :  { %1304 = vst.msk [vmem:[%s3547_s4 + $0x1d0] sm:$0xff] %vm1245_vm3, %v1229_v56  ;;  %1305 = vst.msk [vmem:[%s3547_s4 + $0x1d8] sm:$0xff] %vm1245_vm3, %v1232_v22 }
 0x247   :  { %v802_v37 = vpop.xlane.xlu0 %801  ;;  %v805_v54 = vpop.xlane.xlu1 %804 }
 0x248   :  { %945 = vst.msk [vmem:[%s3547_s4 + $0xc0] sm:$0xff] %vm920_vm2, %v802_v37  ;;  %946 = vst.msk [vmem:[%s3547_s4 + $0xc8] sm:$0xff] %vm920_vm2, %v805_v54 }
 0x24b   :  { %v898_v43 = vpop.xlane.xlu0 %897  ;;  %v901_v8 = vpop.xlane.xlu1 %900 }
 0x24c   :  { %977 = vst.msk [vmem:[%s3547_s4 + $0x1c0] sm:$0xff] %vm920_vm2, %v898_v43  ;;  %978 = vst.msk [vmem:[%s3547_s4 + $0x1c8] sm:$0xff] %vm920_vm2, %v901_v8 }
 0x24f   :  { %v1127_v7 = vpop.xlane.xlu0 %1126  ;;  %v1130_v63 = vpop.xlane.xlu1 %1129 }
 0x250   :  { %1270 = vst.msk [vmem:[%s3547_s4 + $0xc0] sm:$0xff] %vm1245_vm3, %v1127_v7  ;;  %1271 = vst.msk [vmem:[%s3547_s4 + $0xc8] sm:$0xff] %vm1245_vm3, %v1130_v63 }
 0x253   :  { %v1223_v9 = vpop.xlane.xlu0 %1222  ;;  %v1226_v58 = vpop.xlane.xlu1 %1225 }
 0x254   :  { %1302 = vst.msk [vmem:[%s3547_s4 + $0x1c0] sm:$0xff] %vm1245_vm3, %v1223_v9  ;;  %1303 = vst.msk [vmem:[%s3547_s4 + $0x1c8] sm:$0xff] %vm1245_vm3, %v1226_v58 }
 0x257   :  { %v820_v20 = vpop.xlane.xlu0 %819  ;;  %v823_v30 = vpop.xlane.xlu1 %822 }
 0x258   :  { %951 = vst.msk [vmem:[%s3547_s4 + $0xf0] sm:$0xff] %vm920_vm2, %v820_v20  ;;  %952 = vst.msk [vmem:[%s3547_s4 + $0xf8] sm:$0xff] %vm920_vm2, %v823_v30 }
 0x25b   :  { %v916_v12 = vpop.xlane.xlu0 %915  ;;  %v919_v29 = vpop.xlane.xlu1 %918 }
 0x25c   :  { %983 = vst.msk [vmem:[%s3547_s4 + $0x1f0] sm:$0xff] %vm920_vm2, %v916_v12  ;;  %984 = vst.msk [vmem:[%s3547_s4 + $0x1f8] sm:$0xff] %vm920_vm2, %v919_v29 }
 0x25f   :  { %v1145_v35 = vpop.xlane.xlu0 %1144  ;;  %v1148_v16 = vpop.xlane.xlu1 %1147 }
 0x260   :  { %1276 = vst.msk [vmem:[%s3547_s4 + $0xf0] sm:$0xff] %vm1245_vm3, %v1145_v35  ;;  %1277 = vst.msk [vmem:[%s3547_s4 + $0xf8] sm:$0xff] %vm1245_vm3, %v1148_v16 }
 0x263   :  { %v814_v42 = vpop.xlane.xlu0 %813  ;;  %v817_v44 = vpop.xlane.xlu1 %816 }
 0x264   :  { %949 = vst.msk [vmem:[%s3547_s4 + $0xe0] sm:$0xff] %vm920_vm2, %v814_v42  ;;  %950 = vst.msk [vmem:[%s3547_s4 + $0xe8] sm:$0xff] %vm920_vm2, %v817_v44 }
 0x267   :  { %v910_v6 = vpop.xlane.xlu0 %909  ;;  %v913_v17 = vpop.xlane.xlu1 %912 }
 0x268   :  { %981 = vst.msk [vmem:[%s3547_s4 + $0x1e0] sm:$0xff] %vm920_vm2, %v910_v6  ;;  %982 = vst.msk [vmem:[%s3547_s4 + $0x1e8] sm:$0xff] %vm920_vm2, %v913_v17 }
 0x26b   :  { %v1139_v36 = vpop.xlane.xlu0 %1138  ;;  %v1142_v18 = vpop.xlane.xlu1 %1141 }
 0x26c   :  { %1274 = vst.msk [vmem:[%s3547_s4 + $0xe0] sm:$0xff] %vm1245_vm3, %v1139_v36  ;;  %1275 = vst.msk [vmem:[%s3547_s4 + $0xe8] sm:$0xff] %vm1245_vm3, %v1142_v18 }
 0x26f   :  { %v1235_v19 = vpop.xlane.xlu0 %1234  ;;  %v1238_v25 = vpop.xlane.xlu1 %1237 }
 0x270   :  { %1306 = vst.msk [vmem:[%s3547_s4 + $0x1e0] sm:$0xff] %vm1245_vm3, %v1235_v19  ;;  %1307 = vst.msk [vmem:[%s3547_s4 + $0x1e8] sm:$0xff] %vm1245_vm3, %v1238_v25 }
 0x273   :  { %v1241_v39 = vpop.xlane.xlu0 %1240  ;;  %v1244_v57 = vpop.xlane.xlu1 %1243 }
 0x274   :  { %1308 = vst.msk [vmem:[%s3547_s4 + $0x1f0] sm:$0xff] %vm1245_vm3, %v1241_v39  ;;  %1309 = vst.msk [vmem:[%s3547_s4 + $0x1f8] sm:$0xff] %vm1245_vm3, %v1244_v57 }

</bundles_post_ra>
